<compile_context>
chip_gen: v7x
topology: tpu7x:2x2x1
jax: 0.10.0
libtpu: 0.0.40
codegen_flags: <defaults>
</compile_context>

<pallas_src>
import numpy as np
import jax
import jax.numpy as jnp
from jax.experimental import pallas as pl
from jax.experimental.pallas import tpu as pltpu

PAD = 128          # lane width of the packed input / recon tiles
VIEW_IN = 64       # true input size per view
EMB = 16           # embedding size
BLOCK_ROWS = 256   # batch rows per grid step

# True per-layer dims (in, out), PyTorch Linear order, W stored as (in, out):
#  0,1    encoder1 (64->48), (48->32)
#  2,3    encoder2 (64->48), (48->32)
#  4      latent1  (32->16)   (shared by both views)
#  5      latent2  (32->16)   (shared by both views)
#  6,7,8  decoder1 (16->32), (32->48), (48->64)
#  9,10,11 decoder2 (16->32), (32->48), (48->64)
LAYER_DIMS = [
    (64, 48), (48, 32),
    (64, 48), (48, 32),
    (32, 16), (32, 16),
    (16, 32), (32, 48), (48, 64),
    (16, 32), (32, 48), (48, 64),
]

# Six fused stages; each stage is one (fan_in, 128) block-diagonal weight tile.
#   stage 0: enc L1 both views   in [xA|xB]        (128) -> [hA1|hB1]       (96 lanes)
#   stage 1: enc L2 both views   in [hA1|hB1]       (96) -> [hA2|hB2]       (64 lanes)
#   stage 2: latent heads        in [hA2|hB2]       (64) -> [muA|lvA|muB|lvB](64 lanes)
#   stage 3: dec L1 both views   in z               (16) -> [d1A|d1B]       (64 lanes)
#   stage 4: dec L2 both views   in [d1A|d1B]       (64) -> [d2A|d2B]       (96 lanes)
#   stage 5: dec L3 both views   in [d2A|d2B]       (96) -> [reconA|reconB] (128 lanes)
STAGE_ROWS = (128, 96, 64, 16, 64, 96)
STAGE_OFFS = (0, 128, 224, 288, 304, 368)
W_TOTAL_ROWS = sum(STAGE_ROWS)   # 464 sublanes (multiple of 8)
N_STAGES = len(STAGE_ROWS)


def dave_kernel(x_ref, eps_ref, w_ref, b_ref, recon_ref, lat_ref):
    """Full DAVE forward for one batch tile: 6 block-diagonal MXU matmuls."""

    def stage(x, s):
        w = w_ref[STAGE_OFFS[s]:STAGE_OFFS[s] + STAGE_ROWS[s], :]   # static slice, bf16
        y = jnp.dot(x.astype(jnp.bfloat16), w, preferred_element_type=jnp.float32)
        return y + b_ref[s:s + 1, :]                                 # bias in f32

    x = x_ref[...]                                   # [xA | xB] on lanes 0-63 / 64-127

    # encoders (both views at once)
    h = jnp.maximum(stage(x, 0), 0.0)                # [hA1 | hB1 | 0]
    h = jnp.maximum(stage(h[:, :96], 1), 0.0)        # [hA2 | hB2 | 0]

    # shared latent heads -> [muA | logvarA | muB | logvarB] (64 useful lanes)
    lat = stage(h[:, :64], 2)
    lat_ref[...] = lat[:, :4 * EMB]

    muA, lvA = lat[:, 0:EMB], lat[:, EMB:2 * EMB]
    muB, lvB = lat[:, 2 * EMB:3 * EMB], lat[:, 3 * EMB:4 * EMB]
    epsA, epsB = eps_ref[:, 0:EMB], eps_ref[:, EMB:2 * EMB]

    # reparameterize_2_views: z = muA + muB + eps1*exp(0.5*lvA) + eps2*exp(0.5*lvB)
    z = muA + muB + epsA * jnp.exp(0.5 * lvA) + epsB * jnp.exp(0.5 * lvB)

    # decoders (both views at once, fed from the shared z)
    d = jnp.maximum(stage(z, 3), 0.0)                # [d1A | d1B | 0]
    d = jnp.maximum(stage(d[:, :64], 4), 0.0)        # [d2A | d2B | 0]
    recon_ref[...] = jax.nn.sigmoid(stage(d[:, :96], 5))   # [reconA | reconB]


def dave_forward_pallas(xA, xB, epsA, epsB, w_slab, b_slab, *, block_rows=BLOCK_ROWS):
    """Full forward.  xA/xB: (N, 64) f32; epsA/epsB: (N, 16) f32 reparam noise.
    Returns (reconA, reconB, muA, muB, logvarA, logvarB), matching the module."""
    n = xA.shape[0]
    xAB = jnp.concatenate([xA, xB], axis=1).astype(jnp.float32)        # (N, 128)
    eps = jnp.concatenate([epsA, epsB], axis=1).astype(jnp.float32)    # (N, 32)

    n_pad = ((n + block_rows - 1) // block_rows) * block_rows
    if n_pad != n:
        xAB = jnp.pad(xAB, ((0, n_pad - n), (0, 0)))
        eps = jnp.pad(eps, ((0, n_pad - n), (0, 0)))

    row_full = pl.BlockSpec((block_rows, PAD), lambda i: (i, 0))
    recon, lat = pl.pallas_call(
        dave_kernel,
        out_shape=(
            jax.ShapeDtypeStruct((n_pad, PAD), jnp.float32),        # [reconA | reconB]
            jax.ShapeDtypeStruct((n_pad, 4 * EMB), jnp.float32),    # [muA|lvA|muB|lvB]
        ),
        grid=(n_pad // block_rows,),
        in_specs=[
            row_full,                                                  # packed inputs
            pl.BlockSpec((block_rows, 2 * EMB), lambda i: (i, 0)),     # true-width eps
            pl.BlockSpec((W_TOTAL_ROWS, PAD), lambda i: (0, 0)),       # weights: resident
            pl.BlockSpec((N_STAGES, PAD), lambda i: (0, 0)),           # biases: resident
        ],
        out_specs=(row_full,
                   pl.BlockSpec((block_rows, 4 * EMB), lambda i: (i, 0))),
        compiler_params=pltpu.CompilerParams(dimension_semantics=("parallel",)),
    )(xAB, eps, w_slab, b_slab)

    reconA, reconB = recon[:n, :VIEW_IN], recon[:n, VIEW_IN:]
    muA, lvA = lat[:n, 0:EMB], lat[:n, EMB:2 * EMB]
    muB, lvB = lat[:n, 2 * EMB:3 * EMB], lat[:n, 3 * EMB:4 * EMB]
    return reconA, reconB, muA, muB, lvA, lvB


def init_layer_params(key):
    """PyTorch-Linear-style init: U(-1/sqrt(fan_in), 1/sqrt(fan_in)); W stored (in, out)."""
    Ws, Bs = [], []
    for (fin, fout) in LAYER_DIMS:
        key, kw, kb = jax.random.split(key, 3)
        bound = 1.0 / np.sqrt(fin)
        Ws.append(jax.random.uniform(kw, (fin, fout), jnp.float32, -bound, bound))
        Bs.append(jax.random.uniform(kb, (fout,), jnp.float32, -bound, bound))
    return Ws, Bs


def pack_params(Ws, Bs):
    """Pack 12 Linear layers into 6 block-diagonal stage tiles (bf16) + bias rows (f32)."""
    W_slab = np.zeros((W_TOTAL_ROWS, PAD), np.float32)
    B_slab = np.zeros((N_STAGES, PAD), np.float32)

    def put(stage, row0, col0, w_idx):
        fin, fout = LAYER_DIMS[w_idx]
        r = STAGE_OFFS[stage]
        W_slab[r + row0: r + row0 + fin, col0: col0 + fout] = np.asarray(Ws[w_idx])
        B_slab[stage, col0: col0 + fout] = np.asarray(Bs[w_idx])

    put(0, 0, 0, 0);   put(0, 64, 48, 2)      # encoder L1: view1 | view2
    put(1, 0, 0, 1);   put(1, 48, 32, 3)      # encoder L2: view1 | view2
    put(2, 0, 0, 4);   put(2, 0, 16, 5)       # latent heads on hA2 -> muA | lvA
    put(2, 32, 32, 4); put(2, 32, 48, 5)      # latent heads on hB2 -> muB | lvB
    put(3, 0, 0, 6);   put(3, 0, 32, 9)       # decoder L1: dec1 | dec2 (both from z)
    put(4, 0, 0, 7);   put(4, 32, 48, 10)     # decoder L2
    put(5, 0, 0, 8);   put(5, 48, 64, 11)     # decoder L3 (sigmoid)
    return jnp.asarray(W_slab, jnp.bfloat16), jnp.asarray(B_slab, jnp.float32)


def reference_forward(xA, xB, epsA, epsB, Ws, Bs):
    """Pure-JAX f32 reference at true (unpadded) sizes, matching the module's forward."""
    relu = lambda v: jnp.maximum(v, 0.0)
    lin = lambda v, i: v @ Ws[i] + Bs[i]
    hA = relu(lin(relu(lin(xA, 0)), 1))
    hB = relu(lin(relu(lin(xB, 2)), 3))
    muA, lvA = lin(hA, 4), lin(hA, 5)
    muB, lvB = lin(hB, 4), lin(hB, 5)
    z = muA + muB + epsA * jnp.exp(0.5 * lvA) + epsB * jnp.exp(0.5 * lvB)
    reconA = jax.nn.sigmoid(lin(relu(lin(relu(lin(z, 6)), 7)), 8))
    reconB = jax.nn.sigmoid(lin(relu(lin(relu(lin(z, 9)), 10)), 11))
    return reconA, reconB, muA, muB, lvA, lvB


if __name__ == "__main__":
    key = jax.random.PRNGKey(0)
    key, k_params, k_xA, k_xB, k_eA, k_eB = jax.random.split(key, 6)

    Ws, Bs = init_layer_params(k_params)
    W_slab, B_slab = pack_params(Ws, Bs)

    N = 300  # deliberately NOT a multiple of BLOCK_ROWS: exercises wrapper padding (2 grid steps)
    xA = jax.random.normal(k_xA, (N, VIEW_IN), jnp.float32)
    xB = jax.random.normal(k_xB, (N, VIEW_IN), jnp.float32)
    epsA = jax.random.normal(k_eA, (N, EMB), jnp.float32)   # deterministic reparam noise
    epsB = jax.random.normal(k_eB, (N, EMB), jnp.float32)

    out = dave_forward_pallas(xA, xB, epsA, epsB, W_slab, B_slab)
    out = jax.block_until_ready(out)

    # correctness check vs f32 reference (bf16 weights -> loosened tolerance)
    ref = reference_forward(xA, xB, epsA, epsB, Ws, Bs)
    for got, want in zip(out, ref):
        np.testing.assert_allclose(np.asarray(got), np.asarray(want),
                                   rtol=5e-2, atol=5e-2)

    print("KERNEL_OK")
</pallas_src>

<mosaic_0001>
module attributes {stable_mosaic.version = 11 : i64} {
  func.func @dave_kernel(%arg0: i32, %arg1: memref<256x128xf32, #tpu.memory_space<vmem>>, %arg2: memref<256x32xf32, #tpu.memory_space<vmem>>, %arg3: memref<464x128xbf16, #tpu.memory_space<vmem>>, %arg4: memref<6x128xf32, #tpu.memory_space<vmem>>, %arg5: memref<256x128xf32, #tpu.memory_space<vmem>>, %arg6: memref<256x64xf32, #tpu.memory_space<vmem>>) attributes {dimension_semantics = [#tpu.dimension_semantics<parallel>], iteration_bounds = array<i64: 2>, scalar_prefetch = 0 : i64, scratch_operands = 0 : i64, tpu.core_type = #tpu.core_type<tc>, window_params = [{transform_indices = @transform_0, window_bounds = array<i64: 256, 128>}, {transform_indices = @transform_1, window_bounds = array<i64: 256, 32>}, {pipeline_mode = #tpu.pipeline_mode<synchronous>, transform_indices = @transform_2, window_bounds = array<i64: 464, 128>}, {pipeline_mode = #tpu.pipeline_mode<synchronous>, transform_indices = @transform_3, window_bounds = array<i64: 6, 128>}, {transform_indices = @transform_4, window_bounds = array<i64: 256, 128>}, {transform_indices = @transform_5, window_bounds = array<i64: 256, 64>}]} {
    %c0 = arith.constant 0 : index
    %c0_0 = arith.constant 0 : index
    %0 = vector.load %arg1[%c0, %c0_0] : memref<256x128xf32, #tpu.memory_space<vmem>>, vector<256x128xf32>
    %c0_1 = arith.constant 0 : index
    %c0_2 = arith.constant 0 : index
    %1 = vector.load %arg3[%c0_1, %c0_2] : memref<464x128xbf16, #tpu.memory_space<vmem>>, vector<128x128xbf16>
    %2 = arith.truncf %0 : vector<256x128xf32> to vector<256x128xbf16>
    %cst = arith.constant dense<0.000000e+00> : vector<256x128xf32>
    %3 = tpu.matmul %2, %1, %cst {dimension_numbers = #tpu.dot_dimension_numbers<[1], [0], [0], [1], [0, 0, 1, 1], [], []>} : vector<256x128xbf16>, vector<128x128xbf16>, vector<256x128xf32> -> vector<256x128xf32>
    %c0_3 = arith.constant 0 : index
    %c0_4 = arith.constant 0 : index
    %4 = vector.load %arg4[%c0_3, %c0_4] : memref<6x128xf32, #tpu.memory_space<vmem>>, vector<1x128xf32>
    %5 = vector.broadcast %4 : vector<1x128xf32> to vector<256x128xf32>
    %6 = arith.addf %3, %5 : vector<256x128xf32>
    %cst_5 = arith.constant 0.000000e+00 : f32
    %7 = vector.broadcast %cst_5 : f32 to vector<256x128xf32>
    %8 = arith.maximumf %6, %7 : vector<256x128xf32>
    %9 = vector.extract_strided_slice %8 {offsets = [0, 0], sizes = [256, 96], strides = [1, 1]} : vector<256x128xf32> to vector<256x96xf32>
    %c128 = arith.constant 128 : index
    %c0_6 = arith.constant 0 : index
    %10 = vector.load %arg3[%c128, %c0_6] : memref<464x128xbf16, #tpu.memory_space<vmem>>, vector<96x128xbf16>
    %11 = arith.truncf %9 : vector<256x96xf32> to vector<256x96xbf16>
    %cst_7 = arith.constant dense<0.000000e+00> : vector<256x128xf32>
    %12 = tpu.matmul %11, %10, %cst_7 {dimension_numbers = #tpu.dot_dimension_numbers<[1], [0], [0], [1], [0, 0, 1, 1], [], []>} : vector<256x96xbf16>, vector<96x128xbf16>, vector<256x128xf32> -> vector<256x128xf32>
    %c1 = arith.constant 1 : index
    %c0_8 = arith.constant 0 : index
    %13 = vector.load %arg4[%c1, %c0_8] : memref<6x128xf32, #tpu.memory_space<vmem>>, vector<1x128xf32>
    %14 = vector.broadcast %13 : vector<1x128xf32> to vector<256x128xf32>
    %15 = arith.addf %12, %14 : vector<256x128xf32>
    %cst_9 = arith.constant 0.000000e+00 : f32
    %16 = vector.broadcast %cst_9 : f32 to vector<256x128xf32>
    %17 = arith.maximumf %15, %16 : vector<256x128xf32>
    %18 = vector.extract_strided_slice %17 {offsets = [0, 0], sizes = [256, 64], strides = [1, 1]} : vector<256x128xf32> to vector<256x64xf32>
    %c224 = arith.constant 224 : index
    %c0_10 = arith.constant 0 : index
    %19 = vector.load %arg3[%c224, %c0_10] : memref<464x128xbf16, #tpu.memory_space<vmem>>, vector<64x128xbf16>
    %20 = arith.truncf %18 : vector<256x64xf32> to vector<256x64xbf16>
    %cst_11 = arith.constant dense<0.000000e+00> : vector<256x128xf32>
    %21 = tpu.matmul %20, %19, %cst_11 {dimension_numbers = #tpu.dot_dimension_numbers<[1], [0], [0], [1], [0, 0, 1, 1], [], []>} : vector<256x64xbf16>, vector<64x128xbf16>, vector<256x128xf32> -> vector<256x128xf32>
    %c2 = arith.constant 2 : index
    %c0_12 = arith.constant 0 : index
    %22 = vector.load %arg4[%c2, %c0_12] : memref<6x128xf32, #tpu.memory_space<vmem>>, vector<1x128xf32>
    %23 = vector.broadcast %22 : vector<1x128xf32> to vector<256x128xf32>
    %24 = arith.addf %21, %23 : vector<256x128xf32>
    %25 = vector.extract_strided_slice %24 {offsets = [0, 0], sizes = [256, 64], strides = [1, 1]} : vector<256x128xf32> to vector<256x64xf32>
    %c0_13 = arith.constant 0 : index
    %c0_14 = arith.constant 0 : index
    %26 = vector.load %arg6[%c0_13, %c0_14] : memref<256x64xf32, #tpu.memory_space<vmem>>, vector<256x64xf32>
    tpu.vector_store %arg6[%c0_13, %c0_14], %25 {strides = array<i32>} : memref<256x64xf32, #tpu.memory_space<vmem>>, vector<256x64xf32>,
    %27 = vector.extract_strided_slice %24 {offsets = [0, 0], sizes = [256, 16], strides = [1, 1]} : vector<256x128xf32> to vector<256x16xf32>
    %28 = vector.extract_strided_slice %24 {offsets = [0, 16], sizes = [256, 16], strides = [1, 1]} : vector<256x128xf32> to vector<256x16xf32>
    %29 = vector.extract_strided_slice %24 {offsets = [0, 32], sizes = [256, 16], strides = [1, 1]} : vector<256x128xf32> to vector<256x16xf32>
    %30 = vector.extract_strided_slice %24 {offsets = [0, 48], sizes = [256, 16], strides = [1, 1]} : vector<256x128xf32> to vector<256x16xf32>
    %c0_15 = arith.constant 0 : index
    %c0_16 = arith.constant 0 : index
    %31 = vector.load %arg2[%c0_15, %c0_16] : memref<256x32xf32, #tpu.memory_space<vmem>>, vector<256x16xf32>
    %c0_17 = arith.constant 0 : index
    %c16 = arith.constant 16 : index
    %32 = vector.load %arg2[%c0_17, %c16] : memref<256x32xf32, #tpu.memory_space<vmem>>, vector<256x16xf32>
    %33 = arith.addf %27, %29 : vector<256x16xf32>
    %cst_18 = arith.constant 5.000000e-01 : f32
    %34 = vector.broadcast %cst_18 : f32 to vector<256x16xf32>
    %35 = arith.mulf %34, %28 : vector<256x16xf32>
    %36 = math.exp %35 : vector<256x16xf32>
    %37 = arith.mulf %31, %36 : vector<256x16xf32>
    %38 = arith.addf %33, %37 : vector<256x16xf32>
    %cst_19 = arith.constant 5.000000e-01 : f32
    %39 = vector.broadcast %cst_19 : f32 to vector<256x16xf32>
    %40 = arith.mulf %39, %30 : vector<256x16xf32>
    %41 = math.exp %40 : vector<256x16xf32>
    %42 = arith.mulf %32, %41 : vector<256x16xf32>
    %43 = arith.addf %38, %42 : vector<256x16xf32>
    %c288 = arith.constant 288 : index
    %c0_20 = arith.constant 0 : index
    %44 = vector.load %arg3[%c288, %c0_20] : memref<464x128xbf16, #tpu.memory_space<vmem>>, vector<16x128xbf16>
    %45 = arith.truncf %43 : vector<256x16xf32> to vector<256x16xbf16>
    %cst_21 = arith.constant dense<0.000000e+00> : vector<256x128xf32>
    %46 = tpu.matmul %45, %44, %cst_21 {dimension_numbers = #tpu.dot_dimension_numbers<[1], [0], [0], [1], [0, 0, 1, 1], [], []>} : vector<256x16xbf16>, vector<16x128xbf16>, vector<256x128xf32> -> vector<256x128xf32>
    %c3 = arith.constant 3 : index
    %c0_22 = arith.constant 0 : index
    %47 = vector.load %arg4[%c3, %c0_22] : memref<6x128xf32, #tpu.memory_space<vmem>>, vector<1x128xf32>
    %48 = vector.broadcast %47 : vector<1x128xf32> to vector<256x128xf32>
    %49 = arith.addf %46, %48 : vector<256x128xf32>
    %cst_23 = arith.constant 0.000000e+00 : f32
    %50 = vector.broadcast %cst_23 : f32 to vector<256x128xf32>
    %51 = arith.maximumf %49, %50 : vector<256x128xf32>
    %52 = vector.extract_strided_slice %51 {offsets = [0, 0], sizes = [256, 64], strides = [1, 1]} : vector<256x128xf32> to vector<256x64xf32>
    %c304 = arith.constant 304 : index
    %c0_24 = arith.constant 0 : index
    %53 = vector.load %arg3[%c304, %c0_24] : memref<464x128xbf16, #tpu.memory_space<vmem>>, vector<64x128xbf16>
    %54 = arith.truncf %52 : vector<256x64xf32> to vector<256x64xbf16>
    %cst_25 = arith.constant dense<0.000000e+00> : vector<256x128xf32>
    %55 = tpu.matmul %54, %53, %cst_25 {dimension_numbers = #tpu.dot_dimension_numbers<[1], [0], [0], [1], [0, 0, 1, 1], [], []>} : vector<256x64xbf16>, vector<64x128xbf16>, vector<256x128xf32> -> vector<256x128xf32>
    %c4 = arith.constant 4 : index
    %c0_26 = arith.constant 0 : index
    %56 = vector.load %arg4[%c4, %c0_26] : memref<6x128xf32, #tpu.memory_space<vmem>>, vector<1x128xf32>
    %57 = vector.broadcast %56 : vector<1x128xf32> to vector<256x128xf32>
    %58 = arith.addf %55, %57 : vector<256x128xf32>
    %cst_27 = arith.constant 0.000000e+00 : f32
    %59 = vector.broadcast %cst_27 : f32 to vector<256x128xf32>
    %60 = arith.maximumf %58, %59 : vector<256x128xf32>
    %61 = vector.extract_strided_slice %60 {offsets = [0, 0], sizes = [256, 96], strides = [1, 1]} : vector<256x128xf32> to vector<256x96xf32>
    %c368 = arith.constant 368 : index
    %c0_28 = arith.constant 0 : index
    %62 = vector.load %arg3[%c368, %c0_28] : memref<464x128xbf16, #tpu.memory_space<vmem>>, vector<96x128xbf16>
    %63 = arith.truncf %61 : vector<256x96xf32> to vector<256x96xbf16>
    %cst_29 = arith.constant dense<0.000000e+00> : vector<256x128xf32>
    %64 = tpu.matmul %63, %62, %cst_29 {dimension_numbers = #tpu.dot_dimension_numbers<[1], [0], [0], [1], [0, 0, 1, 1], [], []>} : vector<256x96xbf16>, vector<96x128xbf16>, vector<256x128xf32> -> vector<256x128xf32>
    %c5 = arith.constant 5 : index
    %c0_30 = arith.constant 0 : index
    %65 = vector.load %arg4[%c5, %c0_30] : memref<6x128xf32, #tpu.memory_space<vmem>>, vector<1x128xf32>
    %66 = vector.broadcast %65 : vector<1x128xf32> to vector<256x128xf32>
    %67 = arith.addf %64, %66 : vector<256x128xf32>
    %68 = arith.negf %67 : vector<256x128xf32>
    %69 = math.exp %68 : vector<256x128xf32>
    %cst_31 = arith.constant 1.000000e+00 : f32
    %70 = vector.broadcast %cst_31 : f32 to vector<256x128xf32>
    %71 = arith.addf %70, %69 : vector<256x128xf32>
    %72 = arith.divf %70, %71 : vector<256x128xf32>
    %c0_32 = arith.constant 0 : index
    %c0_33 = arith.constant 0 : index
    %73 = vector.load %arg5[%c0_32, %c0_33] : memref<256x128xf32, #tpu.memory_space<vmem>>, vector<256x128xf32>
    tpu.vector_store %arg5[%c0_32, %c0_33], %72 {strides = array<i32>} : memref<256x128xf32, #tpu.memory_space<vmem>>, vector<256x128xf32>,
    return
  }
  func.func @transform_0(%arg0: i32) -> (i32, i32) {
    %c0_i32 = arith.constant 0 : i32
    %c0_i32_0 = arith.constant 0 : i32
    return %arg0, %c0_i32 : i32, i32
  }
  func.func @transform_1(%arg0: i32) -> (i32, i32) {
    %c0_i32 = arith.constant 0 : i32
    %c0_i32_0 = arith.constant 0 : i32
    return %arg0, %c0_i32 : i32, i32
  }
  func.func @transform_2(%arg0: i32) -> (i32, i32) {
    %c0_i32 = arith.constant 0 : i32
    %c0_i32_0 = arith.constant 0 : i32
    %c0_i32_1 = arith.constant 0 : i32
    return %c0_i32, %c0_i32_0 : i32, i32
  }
  func.func @transform_3(%arg0: i32) -> (i32, i32) {
    %c0_i32 = arith.constant 0 : i32
    %c0_i32_0 = arith.constant 0 : i32
    %c0_i32_1 = arith.constant 0 : i32
    return %c0_i32, %c0_i32_0 : i32, i32
  }
  func.func @transform_4(%arg0: i32) -> (i32, i32) {
    %c0_i32 = arith.constant 0 : i32
    %c0_i32_0 = arith.constant 0 : i32
    return %arg0, %c0_i32 : i32, i32
  }
  func.func @transform_5(%arg0: i32) -> (i32, i32) {
    %c0_i32 = arith.constant 0 : i32
    %c0_i32_0 = arith.constant 0 : i32
    return %arg0, %c0_i32 : i32, i32
  }
}

</mosaic_0001>

<bundles_post_ra>
// kernel: tpu_custom_call.1
= control target key start
LH: loop header
LB: loop body
LE: loop exit
PB: predicated region body
PF: predicated region fallthrough
CT: control target
= control target key end

     0   :  { %11 = vsyncpa [#allocation3], 0  ;;  %s5289_s0 = inlined_call_operand.vmem [shape: f32[512,128], index: 0, kind: input, shape index: {}]   ;;  %s5290_s1 = inlined_call_operand.vmem [shape: f32[512,32], index: 1, kind: input, shape index: {}]   ;;  %s5291_s2 = inlined_call_operand.hbm [shape: bf16[464,128], index: 2, kind: input, shape index: {}]   ;;  %s5292_s3 = inlined_call_operand.vmem [shape: f32[6,128], index: 3, kind: input, shape index: {}]   ;;  %s5293_s4 = inlined_call_operand.hbm [shape: f32[512,128], index: 4, kind: output, shape index: {0}]   ;;  %s5294_s5 = inlined_call_operand.vmem [shape: f32[512,64], index: 5, kind: output, shape index: {1}]  }
   0x1   :  { %12 = vsyncpa [#allocation4], 0 }
   0x2   :  { %14 = vsyncpa [#allocation4 + $0x1], 0  ;;  %s4115_s18 = smov 0   ;;  %s4117_s19 = smov 0  }
   0x3   :  { %s4119_s20 = smov 0   ;;  %s4121_s21 = smov 0  }
   0x4 LB: > { %s4136_s22 = sadd.s32 4294967295, %s4075_s21   ;;  %s3163_s23 = sadd.s32 4294967294, %s4075_s21   ;;  %s4075_s21 = sphi %s4121_s21, %s5386_s21   ;;  %s4071_s20 = sphi %s4119_s20, %s5385_s20   ;;  %s4067_s19 = sphi %s4117_s19, %s5384_s19   ;;  %s4063_s18 = sphi %s4115_s18, %s5383_s18  }
   0x5   : > { %s4140_s24 = sadd.s32 1, %s4075_s21   ;;  %s121_s25 = sadd.s32 1, %s4071_s20 }
   0x6   : > { %s118_s26 = ssub.s32 %s4075_s21, %s4140_s24  ;;  %p131_p0 = scmp.ne.s32.totalorder %s4071_s20, %s4067_s19 }
   0x7   : > { %p119_p1 = scmp.eq.s32.totalorder %s118_s26, 0  ;;  %p132_p2 = scmp.eq.s32.totalorder %s4136_s22, 1 }
   0x8   : > { %p137_p3 = scmp.ne.s32.totalorder %s4067_s19, %s4063_s18  ;;  %p138_p4 = scmp.eq.s32.totalorder %s3163_s23, 1 }
   0x9   : > { %s4151_s27 = scalar_select %p119_p1, %s4071_s20, %s121_s25  }
   0xa   : > { %p4153_p5 = por %p132_p2, %p131_p0  ;;  %p4157_p6 = por %p138_p4, %p137_p3 }
   0xb   : > { %p3164_p7 = scmp.ge.s32.totalorder %s4075_s21, 1  ;;  %p171_p8 = scmp.lt.s32.totalorder %s4075_s21, 3 }
   0xc   : > { %s5312_s28 = scalar_select %p4153_p5, 1, 0 }
   0xd   : > { %s5313_s29 = scalar_select %p4157_p6, 1, 0 }
   0xe   : > { %p5295_p9 = scmp.eq.s32.totalorder %s4136_s22, 0  ;;  %p4164_p10 = pnand %p3164_p7, %p171_p8 }
   0xf   : > { %s4077_s6 = smov [#allocation2]   ;;  %s3981_s11 = scalar_lea.hbm %s5291_s2, 3712 }
  0x10   : > { %s5314_s30 = scalar_select %p4164_p10, 1, 0 }
  0x11   : > { %s183_s7 = sshll.u32 %s4077_s6, 4  ;;  %p3710_p11 = pneg %p4164_p10  ;;  %s184_s7 = int_to_ptr.vmem [resolvable:$true] %s183_s7 }
  0x12   : > { %p3982_p13 = scmp.ne.s32.totalorder %s5291_s2, %s3981_s11  ;;  %p3988_p3 = scmp.lt.u32.totalorder %s3981_s11, %s5291_s2 }
  0x13   : > { %p4172_p12 = pnand %p5295_p9, %p3710_p11 }
  0x15   : > { %p3983_p0 = pneg %p4172_p12 }
  0x17   : > { %p3984_p1 = pnand %p3983_p0, %p3982_p13 }
  0x19   : > { %p3985_p2 = pneg %p3984_p1 }
  0x1b   : > { %p3990_p4 = pnand %p3988_p3, %p3985_p2 }
  0x1d   : > { %3993 = shalt.err (!%p3990_p4)
}
  0x1e   : > { %s3994_s16 = scalar_lea.vmem %s184_s7, 3712  ;;  %p4002_p9 = scmp.lt.s32.totalorder %s184_s7, %s184_s7 }
  0x1f   : > { %p3995_p7 = scmp.ne.s32.totalorder %s184_s7, %s3994_s16  ;;  %p4003_p6 = scmp.lt.s32.totalorder %s3994_s16, %s3994_s16 }
  0x21   : > { %p3997_p8 = pnand %p3995_p7, %p3983_p0  ;;  %p4004_p5 = por %p4003_p6, %p4002_p9 }
  0x23   : > { %p3998_p11 = pneg %p3997_p8 }
  0x25   : > { %p4005_p10 = pnand %p4004_p5, %p3998_p11 }
  0x27   : > { %4008 = shalt.err (!%p4005_p10)
}
  0x28   : > { %s4078_s17 = smov 64   ;;  %s4079_s23 = smov 4  }
  0x29   : > { %3713 = dma.hbm_to_vmem [thread:$0]  (!%p4172_p12), %s5291_s2, 3712, %s184_s7, [#allocation3], %s4078_s17, %s4078_s17, %s4079_s23  }
  0x2a   : > { %p5316_p13 = scmp.ne.s32.totalorder %s5314_s30, 0 }
  0x2c   : > { %220 = sbr.rel (%p5316_p13) target bundleno = 1871 (0x74f), region = 36 }
  0x33   : > { %p5317_p1 = scmp.eq.s32.totalorder %s4136_s22, 0 }
  0x35   : > { %4054 = dma.done.wait (%p5317_p1), [#allocation3], 3712   ;;  %p5318_p0 = pmov %p5317_p1 }
  0x36   : > { %s3170_s6 = sshll.u32 %s4136_s22, 5  ;;  %v3760_v0 = vld [vmem:[#allocation2] sm:$0xff]   ;;  %v3761_v1 = vld [vmem:[#allocation2 + $0x8] sm:$0xff]   ;;  %v3762_v2 = vld [vmem:[#allocation2 + $0x10] sm:$0xff]   ;;  %vm657_vm0 = vcmask 785408   ;;  %vm952_vm1 = vcmask 523264  }
  0x37   : > { %4056 = vsyncadd (%p5318_p0), [#allocation3], 4294963584  ;;  %p259_p5 = scmp.lt.s32.totalorder %s3170_s6, 63  ;;  %3454 = vmatprep.subr.bf16.mxu0 %v3760_v0  ;;  %v3763_v3 = vld [vmem:[#allocation2 + $0x18] sm:$0xff]   ;;  %v3764_v7 = vld [vmem:[#allocation2 + $0x20] sm:$0xff]   ;;  %s4080_s25 = smov 96  }
  0x38   : > { %3455 = vmatpush3.bf16.msra.mxu0 %v3760_v0  ;;  %v3765_v8 = vld [vmem:[#allocation2 + $0x28] sm:$0xff]   ;;  %v3766_v9 = vld [vmem:[#allocation2 + $0x30] sm:$0xff]   ;;  %v3768_v10 = vld [vmem:[#allocation2 + $0x40] sm:$0xff]   ;;  %s4081_s26 = smov 112   ;;  %vm1991_vm2 = vcmask 130048   ;;  %s248_s14 = sand.u32 1, %s4067_s19  }
  0x39   : > { %s5388_s6 = smov (!%p259_p5, %s3170_s6), 63  ;;  %3456 = vmatprep.subr.bf16.mxu0 %v3761_v1  ;;  %v3769_v11 = vld [vmem:[#allocation2 + $0x48] sm:$0xff]   ;;  %3502 = vmatprep.subr.bf16.mxu1 %v3768_v10  ;;  %v3767_v12 = vld [vmem:[#allocation2 + $0x38] sm:$0xff]   ;;  %v3770_v13 = vld [vmem:[#allocation2 + $0x50] sm:$0xff]   ;;  %s3169_s15 = sshll.u32 %s248_s14, 8 }
  0x3a   : > { %s4199_s8 = sshll.u32 %s5388_s6, 3  ;;  %3503 = vmatpush3.bf16.msra.mxu1 %v3768_v10  ;;  %v3771_v16 = vld [vmem:[#allocation2 + $0x58] sm:$0xff]   ;;  %v3772_v60 = vld [vmem:[#allocation2 + $0x60] sm:$0xff]   ;;  %v3773_v61 = vld [vmem:[#allocation2 + $0x68] sm:$0xff]   ;;  %s5187_s16 = scalar_lea.vmem [#allocation5], %s3169_s15 }
  0x3b   : > { %s4205_s9 = scalar_lea.vmem %s5289_s0, %s4199_s8  ;;  %3504 = vmatprep.subr.bf16.mxu1 %v3769_v11  ;;  %v3774_v62 = vld [vmem:[#allocation2 + $0x70] sm:$0xff]   ;;  %v4242_v63 = vld [vmem:[%s5292_s3] ss:$0 sm:$0xff]  ;;  %s4354_s23 = scalar_lea.vmem %s5294_s5, %s4199_s8 }
  0x3c   : > { %3457 = vmatpush3.bf16.msra.mxu0 %v3761_v1  ;;  %v278_v4 = vld [vmem:[%s4205_s9] sm:$0xff]  ;;  %v279_v5 = vld [vmem:[%s4205_s9 + $0x8] sm:$0xff]  ;;  %v280_v14 = vld [vmem:[%s4205_s9 + $0x10] sm:$0xff]  ;;  %s4777_s7 = scalar_lea.vmem %s5290_s1, %s4199_s8  ;;  %s3328_s17 = sshll.u32 %s4136_s22, 12 }
  0x3d   : > { %3458 = vmatprep.subr.bf16.mxu0 %v3762_v2  ;;  %v326_v6 = vpack.c.bf16 %v279_v5, %v278_v4  ;;  %v281_v15 = vld [vmem:[%s4205_s9 + $0x18] sm:$0xff]  ;;  %v282_v17 = vld [vmem:[%s4205_s9 + $0x20] sm:$0xff]  ;;  %v283_v18 = vld [vmem:[%s4205_s9 + $0x28] sm:$0xff]  ;;  %s5239_s6 = scalar_lea.hbm %s5293_s4, %s3328_s17  ;;  %s5248_s22 = scalar_lea.sflag [#allocation4], %s248_s14 }
  0x3e   : > { %3505 = vmatpush3.bf16.msra.mxu1 %v3769_v11  ;;  %v327_v19 = vpack.c.bf16 %v281_v15, %v280_v14  ;;  %v328_v20 = vpack.c.bf16 %v283_v18, %v282_v17  ;;  %v284_v21 = vld [vmem:[%s4205_s9 + $0x30] sm:$0xff]  ;;  %v285_v22 = vld [vmem:[%s4205_s9 + $0x38] sm:$0xff]  ;;  %v286_v23 = vld [vmem:[%s4205_s9 + $0x40] sm:$0xff]  ;;  %p5381_p9 = scmp.ne.s32.totalorder %s5312_s28, 0 }
  0x3f   : > { %3470 = vmatprep.mubr.bf16.mxu0 %v326_v6  ;;  %3506 = vmatprep.subr.bf16.mxu1 %v3770_v13  ;;  %v287_v24 = vld [vmem:[%s4205_s9 + $0x48] sm:$0xff]  ;;  %v329_v25 = vpack.c.bf16 %v285_v22, %v284_v21  ;;  %v288_v27 = vld [vmem:[%s4205_s9 + $0x50] sm:$0xff]  ;;  %v289_v28 = vld [vmem:[%s4205_s9 + $0x58] sm:$0xff] }
  0x40   : > { %3459 = vmatpush3.bf16.msra.mxu0 %v3762_v2  ;;  %v330_v26 = vpack.c.bf16 %v287_v24, %v286_v23  ;;  %v290_v29 = vld [vmem:[%s4205_s9 + $0x60] sm:$0xff]  ;;  %v291_v30 = vld [vmem:[%s4205_s9 + $0x68] sm:$0xff]  ;;  %v331_v31 = vpack.c.bf16 %v289_v28, %v288_v27  ;;  %v292_v33 = vld [vmem:[%s4205_s9 + $0x70] sm:$0xff] }
  0x41   : > { %3460 = vmatprep.subr.bf16.mxu0 %v3763_v3  ;;  %v332_v32 = vpack.c.bf16 %v291_v30, %v290_v29  ;;  %v293_v34 = vld [vmem:[%s4205_s9 + $0x78] sm:$0xff]  ;;  %v294_v35 = vld [vmem:[%s4205_s9 + $0x80] sm:$0xff]  ;;  %v295_v36 = vld [vmem:[%s4205_s9 + $0x88] sm:$0xff] }
  0x42   : > { %3507 = vmatpush3.bf16.msra.mxu1 %v3770_v13  ;;  %v333_v37 = vpack.c.bf16 %v293_v34, %v292_v33  ;;  %v334_v38 = vpack.c.bf16 %v295_v36, %v294_v35  ;;  %v296_v39 = vld [vmem:[%s4205_s9 + $0x90] sm:$0xff]  ;;  %v297_v40 = vld [vmem:[%s4205_s9 + $0x98] sm:$0xff]  ;;  %v298_v41 = vld [vmem:[%s4205_s9 + $0xa0] sm:$0xff] }
  0x43   : > { %3508 = vmatprep.subr.bf16.mxu1 %v3771_v16  ;;  %v299_v42 = vld [vmem:[%s4205_s9 + $0xa8] sm:$0xff]  ;;  %v335_v43 = vpack.c.bf16 %v297_v40, %v296_v39  ;;  %v300_v45 = vld [vmem:[%s4205_s9 + $0xb0] sm:$0xff]  ;;  %v301_v46 = vld [vmem:[%s4205_s9 + $0xb8] sm:$0xff] }
  0x44   : > { %3461 = vmatpush3.bf16.msra.mxu0 %v3763_v3  ;;  %v336_v44 = vpack.c.bf16 %v299_v42, %v298_v41  ;;  %v302_v47 = vld [vmem:[%s4205_s9 + $0xc0] sm:$0xff]  ;;  %v303_v48 = vld [vmem:[%s4205_s9 + $0xc8] sm:$0xff]  ;;  %v337_v49 = vpack.c.bf16 %v301_v46, %v300_v45  ;;  %v304_v51 = vld [vmem:[%s4205_s9 + $0xd0] sm:$0xff] }
  0x45   : > { %3462 = vmatprep.subr.bf16.mxu0 %v3764_v7  ;;  %v338_v50 = vpack.c.bf16 %v303_v48, %v302_v47  ;;  %v305_v52 = vld [vmem:[%s4205_s9 + $0xd8] sm:$0xff]  ;;  %v306_v53 = vld [vmem:[%s4205_s9 + $0xe0] sm:$0xff]  ;;  %v307_v54 = vld [vmem:[%s4205_s9 + $0xe8] sm:$0xff] }
  0x46   : > { %3509 = vmatpush3.bf16.msra.mxu1 %v3771_v16  ;;  %v339_v55 = vpack.c.bf16 %v305_v52, %v304_v51  ;;  %v340_v56 = vpack.c.bf16 %v307_v54, %v306_v53  ;;  %v308_v57 = vld [vmem:[%s4205_s9 + $0xf0] sm:$0xff]  ;;  %v309_v58 = vld [vmem:[%s4205_s9 + $0xf8] sm:$0xff]  ;;  %v3777_v33 = vld [vmem:[#allocation2 + $0x88] sm:$0xff]  }
  0x47   : > { %v341_v59 = vpack.c.bf16 %v309_v58, %v308_v57  ;;  %3510 = vmatprep.subr.bf16.mxu1 %v3772_v60  ;;  %v3775_v17 = vld [vmem:[#allocation2 + $0x78] sm:$0xff]  }
  0x48   : > { %3463 = vmatpush3.bf16.msra.mxu0 %v3764_v7 }
  0x49   : > { %3464 = vmatprep.subr.bf16.mxu0 %v3765_v8 }
  0x4a   : > { %3511 = vmatpush3.bf16.msra.mxu1 %v3772_v60 }
  0x4b   : > { %3512 = vmatprep.subr.bf16.mxu1 %v3773_v61 }
  0x4c   : > { %3465 = vmatpush3.bf16.msra.mxu0 %v3765_v8 }
  0x4d   : > { %3466 = vmatprep.subr.bf16.mxu0 %v3766_v9 }
  0x4e   : > { %3513 = vmatpush3.bf16.msra.mxu1 %v3773_v61 }
  0x4f   : > { %3546 = vmatprep.subr.bf16.mxu1 %v3774_v62 }
  0x50   : > { %3467 = vmatpush3.bf16.msra.mxu0 %v3766_v9 }
  0x51   : > { %3468 = vmatprep.subr.bf16.mxu0 %v3767_v12 }
  0x54   : > { %3469 = vmatpush3.bf16.msra.mxu0 %v3767_v12 }
  0x57   : > { %3471 = vmatmul.mubr.bf16.vlgmr.msra.gmra.mrb[0].mxu0 %v327_v19 }
  0x58   : > { %3474 = vmatprep.mubr.bf16.mxu0 %v328_v20 }
  0x5f   : > { %3475 = vmatmul.mubr.bf16.gmra.mrb[4].mxu0 %v329_v25  ;;  %v3776_v25 = vld [vmem:[#allocation2 + $0x80] sm:$0xff]  }
  0x60   : > { %3478 = vmatprep.mubr.bf16.mxu0 %v330_v26 }
  0x67   : > { %3479 = vmatmul.mubr.bf16.gmra.mrb[8].mxu0 %v331_v31 }
  0x68   : > { %3482 = vmatprep.mubr.bf16.mxu0 %v332_v32 }
  0x6f   : > { %3483 = vmatmul.mubr.bf16.gmra.mrb[12].mxu0 %v333_v37 }
  0x70   : > { %3486 = vmatprep.mubr.bf16.mxu0 %v334_v38 }
  0x77   : > { %3487 = vmatmul.mubr.bf16.gmra.mrb[16].mxu0 %v335_v43 }
  0x78   : > { %3490 = vmatprep.mubr.bf16.mxu0 %v336_v44 }
  0x7f   : > { %3491 = vmatmul.mubr.bf16.gmra.mrb[20].mxu0 %v337_v49 }
  0x80   : > { %3494 = vmatprep.mubr.bf16.mxu0 %v338_v50 }
  0x87   : > { %3495 = vmatmul.mubr.bf16.gmra.mrb[24].mxu0 %v339_v55 }
  0x88   : > { %3498 = vmatprep.mubr.bf16.mxu0 %v340_v56 }
  0x8f   : > { %3499 = vmatmul.mubr.bf16.gmra.mrb[28].mxu0 %v341_v59 }
 0x12a   : > { %v3472_v0 = vpop.f32.mrb[0].mxu0 }
 0x12b   : > { %v438_v1 = vadd.f32 %v3472_v0, %v4242_v63  ;;  %v429_v2 = vpop.f32.mrb[1].mxu0 }
 0x12c   : > { %v430_v3 = vadd.f32 %v4242_v63, %v429_v2  ;;  %v3473_v4 = vpop.f32.mrb[2].mxu0 }
 0x12d   : > { %v441_v5 = vadd.f32 %v3473_v4, %v4242_v63  ;;  %v432_v6 = vpop.f32.mrb[3].mxu0  ;;  %v558_v8 = vmax.f32 %v438_v1, 0.0 }
 0x12e   : > { %v433_v7 = vadd.f32 %v4242_v63, %v432_v6  ;;  %v556_v10 = vmax.f32 %v430_v3, 0.0 }
 0x12f   : > { %v559_v9 = vmax.f32 %v441_v5, 0.0 }
 0x130   : > { %v557_v11 = vmax.f32 %v433_v7, 0.0 }
 0x131   : > { %v601_v12 = vpack.c.bf16 %v559_v9, %v558_v8 }
 0x132   : > { %v3476_v13 = vpop.f32.mrb[4].mxu0  ;;  %v600_v14 = vpack.c.bf16 %v557_v11, %v556_v10 }
 0x133   : > { %v454_v15 = vadd.f32 %v3476_v13, %v4242_v63  ;;  %v445_v16 = vpop.f32.mrb[5].mxu0 }
 0x134   : > { %v446_v18 = vadd.f32 %v4242_v63, %v445_v16  ;;  %v3477_v19 = vpop.f32.mrb[6].mxu0  ;;  %3514 = vmatprep.mubr.msk.bf16.mxu1 %vm657_vm0, %v600_v14 }
 0x135   : > { %v457_v20 = vadd.f32 %v3477_v19, %v4242_v63  ;;  %v448_v21 = vpop.f32.mrb[7].mxu0  ;;  %3515 = vmatmul.mubr.msk.bf16.vlgmr.msra.gmra.mrb[0].mxu1 %vm657_vm0, %v601_v12  ;;  %v562_v23 = vmax.f32 %v454_v15, 0.0 }
 0x136   : > { %v449_v22 = vadd.f32 %v4242_v63, %v448_v21  ;;  %3547 = vmatpush3.bf16.msra.mxu1 %v3774_v62  ;;  %v560_v26 = vmax.f32 %v446_v18, 0.0 }
 0x137   : > { %v563_v24 = vmax.f32 %v457_v20, 0.0  ;;  %3548 = vmatprep.subr.bf16.mxu1 %v3775_v17 }
 0x138   : > { %v561_v27 = vmax.f32 %v449_v22, 0.0 }
 0x139   : > { %v603_v28 = vpack.c.bf16 %v563_v24, %v562_v23 }
 0x13a   : > { %v602_v29 = vpack.c.bf16 %v561_v27, %v560_v26  ;;  %v3480_v30 = vpop.f32.mrb[8].mxu0  ;;  %3549 = vmatpush3.bf16.msra.mxu1 %v3775_v17 }
 0x13b   : > { %v470_v31 = vadd.f32 %v3480_v30, %v4242_v63  ;;  %v461_v32 = vpop.f32.mrb[9].mxu0  ;;  %3550 = vmatprep.subr.bf16.mxu1 %v3776_v25 }
 0x13c   : > { %3518 = vmatprep.mubr.msk.bf16.mxu1 %vm657_vm0, %v602_v29  ;;  %v462_v34 = vadd.f32 %v4242_v63, %v461_v32  ;;  %v3481_v35 = vpop.f32.mrb[10].mxu0 }
 0x13d   : > { %v566_v36 = vmax.f32 %v470_v31, 0.0  ;;  %3519 = vmatmul.mubr.msk.bf16.gmra.mrb[4].mxu1 %vm657_vm0, %v603_v28  ;;  %v473_v37 = vadd.f32 %v3481_v35, %v4242_v63  ;;  %v464_v38 = vpop.f32.mrb[11].mxu0 }
 0x13e   : > { %v564_v39 = vmax.f32 %v462_v34, 0.0  ;;  %v465_v40 = vadd.f32 %v4242_v63, %v464_v38  ;;  %3551 = vmatpush3.bf16.msra.mxu1 %v3776_v25 }
 0x13f   : > { %v567_v41 = vmax.f32 %v473_v37, 0.0  ;;  %3552 = vmatprep.subr.bf16.mxu1 %v3777_v33 }
 0x140   : > { %v565_v42 = vmax.f32 %v465_v40, 0.0 }
 0x141   : > { %v605_v43 = vpack.c.bf16 %v567_v41, %v566_v36 }
 0x142   : > { %v604_v44 = vpack.c.bf16 %v565_v42, %v564_v39  ;;  %v3484_v45 = vpop.f32.mrb[12].mxu0  ;;  %3553 = vmatpush3.bf16.msra.mxu1 %v3777_v33 }
 0x143   : > { %v486_v46 = vadd.f32 %v3484_v45, %v4242_v63  ;;  %v477_v47 = vpop.f32.mrb[13].mxu0 }
 0x144   : > { %3522 = vmatprep.mubr.msk.bf16.mxu1 %vm657_vm0, %v604_v44  ;;  %v478_v48 = vadd.f32 %v4242_v63, %v477_v47  ;;  %v3485_v49 = vpop.f32.mrb[14].mxu0 }
 0x145   : > { %3523 = vmatmul.mubr.msk.bf16.gmra.mrb[8].mxu1 %vm657_vm0, %v605_v43  ;;  %v570_v50 = vmax.f32 %v486_v46, 0.0  ;;  %v489_v51 = vadd.f32 %v3485_v49, %v4242_v63  ;;  %v480_v52 = vpop.f32.mrb[15].mxu0 }
 0x146   : > { %v568_v53 = vmax.f32 %v478_v48, 0.0  ;;  %v481_v54 = vadd.f32 %v4242_v63, %v480_v52  ;;  %v4295_v52 = vld [vmem:[%s5292_s3 + $0x1] ss:$0 sm:$0xff] }
 0x147   : > { %v571_v55 = vmax.f32 %v489_v51, 0.0 }
 0x148   : > { %v569_v56 = vmax.f32 %v481_v54, 0.0 }
 0x149   : > { %v607_v57 = vpack.c.bf16 %v571_v55, %v570_v50 }
 0x14a   : > { %v606_v58 = vpack.c.bf16 %v569_v56, %v568_v53  ;;  %v3488_v59 = vpop.f32.mrb[16].mxu0 }
 0x14b   : > { %v502_v60 = vadd.f32 %v3488_v59, %v4242_v63  ;;  %v493_v61 = vpop.f32.mrb[17].mxu0 }
 0x14c   : > { %3526 = vmatprep.mubr.msk.bf16.mxu1 %vm657_vm0, %v606_v58  ;;  %v494_v62 = vadd.f32 %v4242_v63, %v493_v61  ;;  %v3489_v0 = vpop.f32.mrb[18].mxu0 }
 0x14d   : > { %3527 = vmatmul.mubr.msk.bf16.gmra.mrb[12].mxu1 %vm657_vm0, %v607_v57  ;;  %v574_v1 = vmax.f32 %v502_v60, 0.0  ;;  %v505_v2 = vadd.f32 %v3489_v0, %v4242_v63  ;;  %v496_v3 = vpop.f32.mrb[19].mxu0 }
 0x14e   : > { %v572_v4 = vmax.f32 %v494_v62, 0.0  ;;  %v497_v5 = vadd.f32 %v4242_v63, %v496_v3 }
 0x14f   : > { %v575_v6 = vmax.f32 %v505_v2, 0.0 }
 0x150   : > { %v573_v7 = vmax.f32 %v497_v5, 0.0 }
 0x151   : > { %v609_v8 = vpack.c.bf16 %v575_v6, %v574_v1 }
 0x152   : > { %v608_v9 = vpack.c.bf16 %v573_v7, %v572_v4  ;;  %v3492_v10 = vpop.f32.mrb[20].mxu0 }
 0x153   : > { %v518_v11 = vadd.f32 %v3492_v10, %v4242_v63  ;;  %v509_v12 = vpop.f32.mrb[21].mxu0 }
 0x154   : > { %3530 = vmatprep.mubr.msk.bf16.mxu1 %vm657_vm0, %v608_v9  ;;  %v510_v13 = vadd.f32 %v4242_v63, %v509_v12  ;;  %v3493_v14 = vpop.f32.mrb[22].mxu0 }
 0x155   : > { %3531 = vmatmul.mubr.msk.bf16.gmra.mrb[16].mxu1 %vm657_vm0, %v609_v8  ;;  %v578_v15 = vmax.f32 %v518_v11, 0.0  ;;  %v521_v16 = vadd.f32 %v3493_v14, %v4242_v63  ;;  %v512_v17 = vpop.f32.mrb[23].mxu0 }
 0x156   : > { %v576_v18 = vmax.f32 %v510_v13, 0.0  ;;  %v513_v19 = vadd.f32 %v4242_v63, %v512_v17 }
 0x157   : > { %v579_v20 = vmax.f32 %v521_v16, 0.0 }
 0x158   : > { %v577_v21 = vmax.f32 %v513_v19, 0.0 }
 0x159   : > { %v611_v22 = vpack.c.bf16 %v579_v20, %v578_v15 }
 0x15a   : > { %v610_v23 = vpack.c.bf16 %v577_v21, %v576_v18  ;;  %v3496_v24 = vpop.f32.mrb[24].mxu0 }
 0x15b   : > { %v534_v25 = vadd.f32 %v3496_v24, %v4242_v63  ;;  %v525_v26 = vpop.f32.mrb[25].mxu0 }
 0x15c   : > { %3534 = vmatprep.mubr.msk.bf16.mxu1 %vm657_vm0, %v610_v23  ;;  %v526_v27 = vadd.f32 %v4242_v63, %v525_v26  ;;  %v3497_v28 = vpop.f32.mrb[26].mxu0 }
 0x15d   : > { %3535 = vmatmul.mubr.msk.bf16.gmra.mrb[20].mxu1 %vm657_vm0, %v611_v22  ;;  %v582_v29 = vmax.f32 %v534_v25, 0.0  ;;  %v537_v30 = vadd.f32 %v3497_v28, %v4242_v63  ;;  %v528_v31 = vpop.f32.mrb[27].mxu0 }
 0x15e   : > { %v580_v32 = vmax.f32 %v526_v27, 0.0  ;;  %v529_v33 = vadd.f32 %v4242_v63, %v528_v31 }
 0x15f   : > { %v583_v34 = vmax.f32 %v537_v30, 0.0 }
 0x160   : > { %v581_v35 = vmax.f32 %v529_v33, 0.0 }
 0x161   : > { %v613_v36 = vpack.c.bf16 %v583_v34, %v582_v29 }
 0x162   : > { %v612_v37 = vpack.c.bf16 %v581_v35, %v580_v32  ;;  %v3500_v38 = vpop.f32.mrb[28].mxu0 }
 0x163   : > { %v550_v39 = vadd.f32 %v3500_v38, %v4242_v63  ;;  %v541_v40 = vpop.f32.mrb[29].mxu0 }
 0x164   : > { %3538 = vmatprep.mubr.msk.bf16.mxu1 %vm657_vm0, %v612_v37  ;;  %v542_v41 = vadd.f32 %v4242_v63, %v541_v40  ;;  %v3501_v42 = vpop.f32.mrb[30].mxu0 }
 0x165   : > { %3539 = vmatmul.mubr.msk.bf16.gmra.mrb[24].mxu1 %vm657_vm0, %v613_v36  ;;  %v586_v43 = vmax.f32 %v550_v39, 0.0  ;;  %v553_v44 = vadd.f32 %v3501_v42, %v4242_v63  ;;  %v544_v45 = vpop.f32.mrb[31].mxu0 }
 0x166   : > { %v584_v46 = vmax.f32 %v542_v41, 0.0  ;;  %v545_v47 = vadd.f32 %v4242_v63, %v544_v45 }
 0x167   : > { %v587_v48 = vmax.f32 %v553_v44, 0.0 }
 0x168   : > { %v585_v49 = vmax.f32 %v545_v47, 0.0 }
 0x169   : > { %v615_v50 = vpack.c.bf16 %v587_v48, %v586_v43 }
 0x16a   : > { %v614_v51 = vpack.c.bf16 %v585_v49, %v584_v46 }
 0x16c   : > { %3542 = vmatprep.mubr.msk.bf16.mxu1 %vm657_vm0, %v614_v51 }
 0x16d   : > { %3543 = vmatmul.mubr.msk.bf16.gmra.mrb[28].mxu1 %vm657_vm0, %v615_v50 }
 0x208   : > { %v3516_v53 = vpop.f32.mrb[0].mxu1 }
 0x209   : > { %v749_v54 = vadd.f32 %v3516_v53, %v4295_v52  ;;  %v740_v55 = vpop.f32.mrb[1].mxu1 }
 0x20a   : > { %v741_v56 = vadd.f32 %v4295_v52, %v740_v55  ;;  %v3517_v63 = vpop.f32.mrb[2].mxu1 }
 0x20b   : > { %v752_v57 = vadd.f32 %v3517_v63, %v4295_v52  ;;  %v743_v58 = vpop.f32.mrb[3].mxu1  ;;  %v869_v60 = vmax.f32 %v749_v54, 0.0 }
 0x20c   : > { %v744_v59 = vadd.f32 %v4295_v52, %v743_v58  ;;  %v867_v62 = vmax.f32 %v741_v56, 0.0 }
 0x20d   : > { %v870_v61 = vmax.f32 %v752_v57, 0.0 }
 0x20e   : > { %v868_v0 = vmax.f32 %v744_v59, 0.0 }
 0x20f   : > { %v908_v1 = vpack.c.bf16 %v870_v61, %v869_v60 }
 0x210   : > { %v907_v2 = vpack.c.bf16 %v868_v0, %v867_v62  ;;  %v3520_v3 = vpop.f32.mrb[4].mxu1 }
 0x211   : > { %v765_v4 = vadd.f32 %v3520_v3, %v4295_v52  ;;  %v756_v5 = vpop.f32.mrb[5].mxu1 }
 0x212   : > { %v757_v6 = vadd.f32 %v4295_v52, %v756_v5  ;;  %v3521_v7 = vpop.f32.mrb[6].mxu1  ;;  %3554 = vmatprep.mubr.msk.bf16.mxu1 %vm952_vm1, %v907_v2 }
 0x213   : > { %v768_v8 = vadd.f32 %v3521_v7, %v4295_v52  ;;  %v759_v9 = vpop.f32.mrb[7].mxu1  ;;  %3555 = vmatmul.mubr.msk.bf16.vlgmr.msra.gmra.mrb[32].mxu1 %vm952_vm1, %v908_v1  ;;  %v873_v11 = vmax.f32 %v765_v4, 0.0 }
 0x214   : > { %v760_v10 = vadd.f32 %v4295_v52, %v759_v9  ;;  %v871_v13 = vmax.f32 %v757_v6, 0.0 }
 0x215   : > { %v874_v12 = vmax.f32 %v768_v8, 0.0 }
 0x216   : > { %v872_v14 = vmax.f32 %v760_v10, 0.0 }
 0x217   : > { %v910_v15 = vpack.c.bf16 %v874_v12, %v873_v11 }
 0x218   : > { %v909_v16 = vpack.c.bf16 %v872_v14, %v871_v13  ;;  %v3524_v17 = vpop.f32.mrb[8].mxu1 }
 0x219   : > { %v781_v18 = vadd.f32 %v3524_v17, %v4295_v52  ;;  %v772_v19 = vpop.f32.mrb[9].mxu1 }
 0x21a   : > { %3558 = vmatprep.mubr.msk.bf16.mxu1 %vm952_vm1, %v909_v16  ;;  %v773_v20 = vadd.f32 %v4295_v52, %v772_v19  ;;  %v3525_v21 = vpop.f32.mrb[10].mxu1 }
 0x21b   : > { %v877_v22 = vmax.f32 %v781_v18, 0.0  ;;  %3559 = vmatmul.mubr.msk.bf16.gmra.mrb[36].mxu1 %vm952_vm1, %v910_v15  ;;  %v784_v23 = vadd.f32 %v3525_v21, %v4295_v52  ;;  %v775_v24 = vpop.f32.mrb[11].mxu1 }
 0x21c   : > { %v875_v25 = vmax.f32 %v773_v20, 0.0  ;;  %v776_v26 = vadd.f32 %v4295_v52, %v775_v24 }
 0x21d   : > { %v878_v27 = vmax.f32 %v784_v23, 0.0 }
 0x21e   : > { %v876_v28 = vmax.f32 %v776_v26, 0.0 }
 0x21f   : > { %v912_v29 = vpack.c.bf16 %v878_v27, %v877_v22 }
 0x220   : > { %v911_v30 = vpack.c.bf16 %v876_v28, %v875_v25  ;;  %v3528_v31 = vpop.f32.mrb[12].mxu1 }
 0x221   : > { %v797_v32 = vadd.f32 %v3528_v31, %v4295_v52  ;;  %v788_v33 = vpop.f32.mrb[13].mxu1 }
 0x222   : > { %3562 = vmatprep.mubr.msk.bf16.mxu1 %vm952_vm1, %v911_v30  ;;  %v789_v34 = vadd.f32 %v4295_v52, %v788_v33  ;;  %v3529_v35 = vpop.f32.mrb[14].mxu1 }
 0x223   : > { %3563 = vmatmul.mubr.msk.bf16.gmra.mrb[40].mxu1 %vm952_vm1, %v912_v29  ;;  %v881_v36 = vmax.f32 %v797_v32, 0.0  ;;  %v800_v37 = vadd.f32 %v3529_v35, %v4295_v52  ;;  %v791_v38 = vpop.f32.mrb[15].mxu1 }
 0x224   : > { %v879_v39 = vmax.f32 %v789_v34, 0.0  ;;  %v792_v40 = vadd.f32 %v4295_v52, %v791_v38  ;;  %v4348_v38 = vld [vmem:[%s5292_s3 + $0x2] ss:$0 sm:$0xff] }
 0x225   : > { %v882_v41 = vmax.f32 %v800_v37, 0.0 }
 0x226   : > { %v880_v42 = vmax.f32 %v792_v40, 0.0 }
 0x227   : > { %v914_v43 = vpack.c.bf16 %v882_v41, %v881_v36 }
 0x228   : > { %v913_v44 = vpack.c.bf16 %v880_v42, %v879_v39  ;;  %v3532_v45 = vpop.f32.mrb[16].mxu1 }
 0x229   : > { %v813_v46 = vadd.f32 %v3532_v45, %v4295_v52  ;;  %v804_v47 = vpop.f32.mrb[17].mxu1 }
 0x22a   : > { %3566 = vmatprep.mubr.msk.bf16.mxu1 %vm952_vm1, %v913_v44  ;;  %v805_v48 = vadd.f32 %v4295_v52, %v804_v47  ;;  %v3533_v49 = vpop.f32.mrb[18].mxu1 }
 0x22b   : > { %3567 = vmatmul.mubr.msk.bf16.gmra.mrb[44].mxu1 %vm952_vm1, %v914_v43  ;;  %v885_v50 = vmax.f32 %v813_v46, 0.0  ;;  %v816_v51 = vadd.f32 %v3533_v49, %v4295_v52  ;;  %v807_v53 = vpop.f32.mrb[19].mxu1 }
 0x22c   : > { %v883_v54 = vmax.f32 %v805_v48, 0.0  ;;  %v808_v55 = vadd.f32 %v4295_v52, %v807_v53 }
 0x22d   : > { %v886_v56 = vmax.f32 %v816_v51, 0.0 }
 0x22e   : > { %v884_v63 = vmax.f32 %v808_v55, 0.0 }
 0x22f   : > { %v916_v57 = vpack.c.bf16 %v886_v56, %v885_v50 }
 0x230   : > { %v915_v58 = vpack.c.bf16 %v884_v63, %v883_v54  ;;  %v3536_v59 = vpop.f32.mrb[20].mxu1 }
 0x231   : > { %v829_v60 = vadd.f32 %v3536_v59, %v4295_v52  ;;  %v820_v61 = vpop.f32.mrb[21].mxu1 }
 0x232   : > { %3570 = vmatprep.mubr.msk.bf16.mxu1 %vm952_vm1, %v915_v58  ;;  %v821_v62 = vadd.f32 %v4295_v52, %v820_v61  ;;  %v3537_v0 = vpop.f32.mrb[22].mxu1 }
 0x233   : > { %3571 = vmatmul.mubr.msk.bf16.gmra.mrb[48].mxu1 %vm952_vm1, %v916_v57  ;;  %v889_v1 = vmax.f32 %v829_v60, 0.0  ;;  %v832_v2 = vadd.f32 %v3537_v0, %v4295_v52  ;;  %v823_v3 = vpop.f32.mrb[23].mxu1 }
 0x234   : > { %v887_v4 = vmax.f32 %v821_v62, 0.0  ;;  %v824_v5 = vadd.f32 %v4295_v52, %v823_v3 }
 0x235   : > { %v890_v6 = vmax.f32 %v832_v2, 0.0 }
 0x236   : > { %v888_v7 = vmax.f32 %v824_v5, 0.0 }
 0x237   : > { %v918_v8 = vpack.c.bf16 %v890_v6, %v889_v1 }
 0x238   : > { %v917_v9 = vpack.c.bf16 %v888_v7, %v887_v4  ;;  %v3540_v10 = vpop.f32.mrb[24].mxu1 }
 0x239   : > { %v845_v11 = vadd.f32 %v3540_v10, %v4295_v52  ;;  %v836_v12 = vpop.f32.mrb[25].mxu1 }
 0x23a   : > { %3574 = vmatprep.mubr.msk.bf16.mxu1 %vm952_vm1, %v917_v9  ;;  %v837_v13 = vadd.f32 %v4295_v52, %v836_v12  ;;  %v3541_v14 = vpop.f32.mrb[26].mxu1 }
 0x23b   : > { %3575 = vmatmul.mubr.msk.bf16.gmra.mrb[52].mxu1 %vm952_vm1, %v918_v8  ;;  %v893_v15 = vmax.f32 %v845_v11, 0.0  ;;  %v848_v16 = vadd.f32 %v3541_v14, %v4295_v52  ;;  %v839_v17 = vpop.f32.mrb[27].mxu1 }
 0x23c   : > { %v891_v18 = vmax.f32 %v837_v13, 0.0  ;;  %v840_v19 = vadd.f32 %v4295_v52, %v839_v17 }
 0x23d   : > { %v894_v20 = vmax.f32 %v848_v16, 0.0 }
 0x23e   : > { %v892_v21 = vmax.f32 %v840_v19, 0.0 }
 0x23f   : > { %v920_v22 = vpack.c.bf16 %v894_v20, %v893_v15 }
 0x240   : > { %v919_v23 = vpack.c.bf16 %v892_v21, %v891_v18  ;;  %v3544_v24 = vpop.f32.mrb[28].mxu1 }
 0x241   : > { %v861_v25 = vadd.f32 %v3544_v24, %v4295_v52  ;;  %v852_v26 = vpop.f32.mrb[29].mxu1 }
 0x242   : > { %3578 = vmatprep.mubr.msk.bf16.mxu1 %vm952_vm1, %v919_v23  ;;  %v853_v27 = vadd.f32 %v4295_v52, %v852_v26  ;;  %v3545_v28 = vpop.f32.mrb[30].mxu1 }
 0x243   : > { %3579 = vmatmul.mubr.msk.bf16.gmra.mrb[56].mxu1 %vm952_vm1, %v920_v22  ;;  %v897_v29 = vmax.f32 %v861_v25, 0.0  ;;  %v864_v30 = vadd.f32 %v3545_v28, %v4295_v52  ;;  %v855_v31 = vpop.f32.mrb[31].mxu1 }
 0x244   : > { %v895_v32 = vmax.f32 %v853_v27, 0.0  ;;  %v856_v33 = vadd.f32 %v4295_v52, %v855_v31 }
 0x245   : > { %v898_v34 = vmax.f32 %v864_v30, 0.0 }
 0x246   : > { %v896_v35 = vmax.f32 %v856_v33, 0.0 }
 0x247   : > { %v922_v36 = vpack.c.bf16 %v898_v34, %v897_v29 }
 0x248   : > { %v921_v37 = vpack.c.bf16 %v896_v35, %v895_v32 }
 0x24a   : > { %3582 = vmatprep.mubr.msk.bf16.mxu1 %vm952_vm1, %v921_v37 }
 0x24b   : > { %3583 = vmatmul.mubr.msk.bf16.gmra.mrb[60].mxu1 %vm952_vm1, %v922_v36 }
 0x2e6   : > { %v3556_v52 = vpop.f32.mrb[32].mxu1 }
 0x2e7   : > { %v4357_v39 = vadd.f32 %v3556_v52, %v4348_v38  ;;  %v1035_v40 = vpop.f32.mrb[33].mxu1 }
 0x2e8   : > { %v4360_v41 = vadd.f32 %v4348_v38, %v1035_v40  ;;  %v3557_v42 = vpop.f32.mrb[34].mxu1 }
 0x2e9   : > { %1164 = vst.msk [vmem:[%s4354_s23 + $0x10] sm:$0xff] %vm952_vm1, %v4357_v39  ;;  %v1388_v43 = vmul.f32 0.5, %v4357_v39  ;;  %v4367_v44 = vadd.f32 %v3557_v42, %v4348_v38  ;;  %1262 = vrot.lane.b32.xlu0 %v4357_v39, %s4080_s25  ;;  %v1038_v45 = vpop.f32.mrb[35].mxu1 }
 0x2ea   : > { %1162 = vst.msk [vmem:[%s4354_s23] sm:$0xff] %vm952_vm1, %v4360_v41  ;;  %v1386_v46 = vmul.f32 0.5, %v4360_v41  ;;  %v4376_v47 = vadd.f32 %v4348_v38, %v1038_v45 }
 0x2eb   : > { %v1422_v48 = vmul.f32 1.442695, %v1388_v43  ;;  %1165 = vst.msk [vmem:[%s4354_s23 + $0x18] sm:$0xff] %vm952_vm1, %v4367_v44  ;;  %1264 = vrot.lane.b32.xlu1 %v4367_v44, %s4080_s25  ;;  %v1389_v49 = vmul.f32 0.5, %v4367_v44 }
 0x2ec   : > { %1163 = vst.msk [vmem:[%s4354_s23 + $0x8] sm:$0xff] %vm952_vm1, %v4376_v47  ;;  %v1418_v50 = vmul.f32 1.442695, %v1386_v46  ;;  %v1387_v60 = vmul.f32 0.5, %v4376_v47 }
 0x2ed   : > { %3789 = vpow2.f32 %v1422_v48  ;;  %1258 = vrot.lane.b32.xlu0 %v4360_v41, %s4080_s25  ;;  %v1424_v55 = vmul.f32 1.442695, %v1389_v49 }
 0x2ee   : > { %v3560_v51 = vpop.f32.mrb[36].mxu1  ;;  %3791 = vpow2.f32 %v1418_v50  ;;  %v1420_v2 = vmul.f32 1.442695, %v1387_v60 }
 0x2ef   : > { %v4390_v53 = vadd.f32 %v3560_v51, %v4348_v38  ;;  %v1051_v54 = vpop.f32.mrb[37].mxu1  ;;  %1260 = vrot.lane.b32.xlu1 %v4376_v47, %s4080_s25  ;;  %3793 = vpow2.f32 %v1424_v55 }
 0x2f0   : > { %v4395_v56 = vadd.f32 %v4348_v38, %v1051_v54  ;;  %v3561_v63 = vpop.f32.mrb[38].mxu1  ;;  %3795 = vpow2.f32 %v1420_v2 }
 0x2f1   : > { %5319 = vst [vmem:[#allocation8_spill] sm:$0xff] %v4390_v53  ;;  %1168 = vst.msk [vmem:[%s4354_s23 + $0x30] sm:$0xff] %vm952_vm1, %v4390_v53  ;;  %v4401_v57 = vadd.f32 %v3561_v63, %v4348_v38  ;;  %v1054_v58 = vpop.f32.mrb[39].mxu1  ;;  %1270 = vrot.lane.b32.xlu0 %v4390_v53, %s4080_s25  ;;  %v1392_v10 = vmul.f32 0.5, %v4390_v53  ;;  %v1209_v53 = vld [vmem:[%s4777_s7 + $0x78] sm:$0xff] }
 0x2f2   : > { %5320 = vst [vmem:[#allocation9_spill] sm:$0xff] %v4395_v56  ;;  %1166 = vst.msk [vmem:[%s4354_s23 + $0x20] sm:$0xff] %vm952_vm1, %v4395_v56  ;;  %v4409_v59 = vadd.f32 %v4348_v38, %v1054_v58  ;;  %v1390_v23 = vmul.f32 0.5, %v4395_v56 }
 0x2f3   : > { %5321 = vst [vmem:[#allocation10_spill] sm:$0xff] %v4401_v57  ;;  %1169 = vst.msk [vmem:[%s4354_s23 + $0x38] sm:$0xff] %vm952_vm1, %v4401_v57  ;;  %1272 = vrot.lane.b32.xlu1 %v4401_v57, %s4080_s25  ;;  %v1393_v14 = vmul.f32 0.5, %v4401_v57  ;;  %v1430_v19 = vmul.f32 1.442695, %v1392_v10  ;;  %v4827_v57 = vld [vmem:[%s4777_s7 + $0x20] sm:$0xff] }
 0x2f4   : > { %5322 = vst [vmem:[#allocation11_spill] sm:$0xff] %v4409_v59  ;;  %1167 = vst.msk [vmem:[%s4354_s23 + $0x28] sm:$0xff] %vm952_vm1, %v4409_v59  ;;  %v1391_v27 = vmul.f32 0.5, %v4409_v59  ;;  %v1426_v32 = vmul.f32 1.442695, %v1390_v23 }
 0x2f5   : > { %1266 = vrot.lane.b32.xlu0 %v4395_v56, %s4080_s25  ;;  %v1432_v21 = vmul.f32 1.442695, %v1393_v14  ;;  %3797 = vpow2.f32 %v1430_v19  ;;  %5347 = vst [vmem:[#allocation36_spill] sm:$0xff] %v4827_v57 }
 0x2f6   : > { %v3564_v61 = vpop.f32.mrb[40].mxu1  ;;  %v1428_v34 = vmul.f32 1.442695, %v1391_v27 }
 0x2f7   : > { %v3790_v62 = vpop.eup %3789  ;;  %1268 = vrot.lane.b32.xlu1 %v4409_v59, %s4080_s25  ;;  %v4425_v0 = vadd.f32 %v3564_v61, %v4348_v38  ;;  %v1067_v1 = vpop.f32.mrb[41].mxu1  ;;  %3799 = vpow2.f32 %v1432_v21 }
 0x2f8   : > { %v4428_v3 = vadd.f32 %v4348_v38, %v1067_v1  ;;  %v3565_v4 = vpop.f32.mrb[42].mxu1  ;;  %v3792_v8 = vpop.eup %3791  ;;  %3801 = vpow2.f32 %v1426_v32 }
 0x2f9   : > { %5323 = vst [vmem:[#allocation12_spill] sm:$0xff] %v4425_v0  ;;  %1172 = vst.msk [vmem:[%s4354_s23 + $0x50] sm:$0xff] %vm952_vm1, %v4425_v0  ;;  %1518 = vrot.lane.b32.xlu0 %v3790_v62, %s4081_s26  ;;  %v4435_v5 = vadd.f32 %v3565_v4, %v4348_v38  ;;  %v1070_v6 = vpop.f32.mrb[43].mxu1  ;;  %v3794_v9 = vpop.eup %3793  ;;  %3803 = vpow2.f32 %v1428_v34  ;;  %v1396_v49 = vmul.f32 0.5, %v4425_v0 }
 0x2fa   : > { %5324 = vst [vmem:[#allocation13_spill] sm:$0xff] %v4428_v3  ;;  %1170 = vst.msk [vmem:[%s4354_s23 + $0x40] sm:$0xff] %vm952_vm1, %v4428_v3  ;;  %v4441_v7 = vadd.f32 %v4348_v38, %v1070_v6  ;;  %v3796_v22 = vpop.eup %3795 }
 0x2fb   : > { %5325 = vst [vmem:[#allocation14_spill] sm:$0xff] %v4435_v5  ;;  %1173 = vst.msk [vmem:[%s4354_s23 + $0x58] sm:$0xff] %vm952_vm1, %v4435_v5  ;;  %1678 = vrot.lane.b32.xlu1 %v3790_v62, %s4080_s25  ;;  %v1397_v63 = vmul.f32 0.5, %v4435_v5  ;;  %v1438_v2 = vmul.f32 1.442695, %v1396_v49 }
 0x2fc   : > { %5326 = vst [vmem:[#allocation15_spill] sm:$0xff] %v4441_v7  ;;  %1171 = vst.msk [vmem:[%s4354_s23 + $0x48] sm:$0xff] %vm952_vm1, %v4441_v7 }
 0x2fd   : > { %1674 = vrot.lane.b32.xlu0 %v3792_v8, %s4080_s25  ;;  %v1440_v6 = vmul.f32 1.442695, %v1397_v63  ;;  %3805 = vpow2.f32 %v1438_v2 }
 0x2fe   : > { %v3568_v11 = vpop.f32.mrb[44].mxu1 }
 0x2ff   : > { %1680 = vrot.lane.b32.xlu1 %v3794_v9, %s4080_s25  ;;  %v4454_v12 = vadd.f32 %v3568_v11, %v4348_v38  ;;  %v1083_v13 = vpop.f32.mrb[45].mxu1  ;;  %v3798_v52 = vpop.eup %3797  ;;  %3807 = vpow2.f32 %v1440_v6 }
 0x300   : > { %v4458_v15 = vadd.f32 %v4348_v38, %v1083_v13  ;;  %v3569_v16 = vpop.f32.mrb[46].mxu1  ;;  %v1395_v13 = vmul.f32 0.5, %v4441_v7 }
 0x301   : > { %5327 = vst [vmem:[#allocation16_spill] sm:$0xff] %v4454_v12  ;;  %1514 = vrot.lane.b32.xlu0 %v3792_v8, %s4081_s26  ;;  %1176 = vst.msk [vmem:[%s4354_s23 + $0x70] sm:$0xff] %vm952_vm1, %v4454_v12  ;;  %v4465_v17 = vadd.f32 %v3569_v16, %v4348_v38  ;;  %v1086_v18 = vpop.f32.mrb[47].mxu1  ;;  %v3800_v46 = vpop.eup %3799  ;;  %v1394_v8 = vmul.f32 0.5, %v4428_v3 }
 0x302   : > { %1174 = vst.msk [vmem:[%s4354_s23 + $0x60] sm:$0xff] %vm952_vm1, %v4458_v15  ;;  %v4471_v20 = vadd.f32 %v4348_v38, %v1086_v18  ;;  %v3802_v55 = vpop.eup %3801  ;;  %v1436_v23 = vmul.f32 1.442695, %v1395_v13 }
 0x303   : > { %5328 = vst [vmem:[#allocation17_spill] sm:$0xff] %v4465_v17  ;;  %1520 = vrot.lane.b32.xlu1 %v3794_v9, %s4081_s26  ;;  %1177 = vst.msk [vmem:[%s4354_s23 + $0x78] sm:$0xff] %vm952_vm1, %v4465_v17  ;;  %v3804_v1 = vpop.eup %3803  ;;  %v1434_v21 = vmul.f32 1.442695, %v1394_v8 }
 0x304   : > { %1175 = vst.msk [vmem:[%s4354_s23 + $0x68] sm:$0xff] %vm952_vm1, %v4471_v20 }
 0x305   : > { %1278 = vrot.lane.b32.xlu0 %v4425_v0, %s4080_s25  ;;  %3809 = vpow2.f32 %v1434_v21 }
 0x306   : > { %v3572_v24 = vpop.f32.mrb[48].mxu1  ;;  %3811 = vpow2.f32 %v1436_v23 }
 0x307   : > { %1516 = vrot.lane.b32.xlu1 %v3796_v22, %s4081_s26  ;;  %v4485_v25 = vadd.f32 %v3572_v24, %v4348_v38  ;;  %v1099_v26 = vpop.f32.mrb[49].mxu1  ;;  %v3806_v24 = vpop.eup %3805 }
 0x308   : > { %v4489_v28 = vadd.f32 %v4348_v38, %v1099_v26  ;;  %v3573_v29 = vpop.f32.mrb[50].mxu1  ;;  %v1400_v26 = vmul.f32 0.5, %v4454_v12 }
 0x309   : > { %1274 = vrot.lane.b32.xlu0 %v4428_v3, %s4080_s25  ;;  %1180 = vst.msk [vmem:[%s4354_s23 + $0x90] sm:$0xff] %vm952_vm1, %v4485_v25  ;;  %v4497_v30 = vadd.f32 %v3573_v29, %v4348_v38  ;;  %v1102_v31 = vpop.f32.mrb[51].mxu1  ;;  %v1401_v29 = vmul.f32 0.5, %v4465_v17  ;;  %v1404_v49 = vmul.f32 0.5, %v4485_v25  ;;  %v1205_v3 = vld [vmem:[%s4777_s7 + $0x58] sm:$0xff] }
 0x30a   : > { %1178 = vst.msk [vmem:[%s4354_s23 + $0x80] sm:$0xff] %vm952_vm1, %v4489_v28  ;;  %v4503_v33 = vadd.f32 %v4348_v38, %v1102_v31  ;;  %v1446_v32 = vmul.f32 1.442695, %v1400_v26 }
 0x30b   : > { %1280 = vrot.lane.b32.xlu1 %v4435_v5, %s4080_s25  ;;  %1181 = vst.msk [vmem:[%s4354_s23 + $0x98] sm:$0xff] %vm952_vm1, %v4497_v30  ;;  %v1448_v34 = vmul.f32 1.442695, %v1401_v29  ;;  %v1454_v63 = vmul.f32 1.442695, %v1404_v49  ;;  %v4786_v5 = vld [vmem:[%s4777_s7 + $0x10] sm:$0xff] }
 0x30c   : > { %1179 = vst.msk [vmem:[%s4354_s23 + $0x88] sm:$0xff] %vm952_vm1, %v4503_v33  ;;  %3813 = vpow2.f32 %v1446_v32 }
 0x30d   : > { %1676 = vrot.lane.b32.xlu0 %v3796_v22, %s4080_s25  ;;  %3815 = vpow2.f32 %v1448_v34 }
 0x30e   : > { %v3576_v35 = vpop.f32.mrb[52].mxu1 }
 0x30f   : > { %1276 = vrot.lane.b32.xlu1 %v4441_v7, %s4080_s25  ;;  %v4517_v36 = vadd.f32 %v3576_v35, %v4348_v38  ;;  %v1115_v37 = vpop.f32.mrb[53].mxu1  ;;  %v1398_v35 = vmul.f32 0.5, %v4458_v15 }
 0x310   : > { %v4520_v40 = vadd.f32 %v4348_v38, %v1115_v37  ;;  %v3577_v42 = vpop.f32.mrb[54].mxu1  ;;  %v1399_v37 = vmul.f32 0.5, %v4471_v20 }
 0x311   : > { %1686 = vrot.lane.b32.xlu0 %v3798_v52, %s4080_s25  ;;  %1184 = vst.msk [vmem:[%s4354_s23 + $0xb0] sm:$0xff] %vm952_vm1, %v4517_v36  ;;  %v4527_v43 = vadd.f32 %v3577_v42, %v4348_v38  ;;  %v1118_v45 = vpop.f32.mrb[55].mxu1 }
 0x312   : > { %1182 = vst.msk [vmem:[%s4354_s23 + $0xa0] sm:$0xff] %vm952_vm1, %v4520_v40  ;;  %v4533_v48 = vadd.f32 %v4348_v38, %v1118_v45  ;;  %v1444_v42 = vmul.f32 1.442695, %v1399_v37  ;;  %v1406_v32 = vmul.f32 0.5, %v4520_v40 }
 0x313   : > { %1688 = vrot.lane.b32.xlu1 %v3800_v46, %s4080_s25  ;;  %1185 = vst.msk [vmem:[%s4354_s23 + $0xb8] sm:$0xff] %vm952_vm1, %v4527_v43  ;;  %v1409_v23 = vmul.f32 0.5, %v4527_v43 }
 0x314   : > { %1183 = vst.msk [vmem:[%s4354_s23 + $0xa8] sm:$0xff] %vm952_vm1, %v4533_v48 }
 0x315   : > { %1526 = vrot.lane.b32.xlu0 %v3798_v52, %s4081_s26  ;;  %v1442_v52 = vmul.f32 1.442695, %v1398_v35  ;;  %v1464_v29 = vmul.f32 1.442695, %v1409_v23  ;;  %v1407_v35 = vmul.f32 0.5, %v4533_v48 }
 0x316   : > { %v3580_v50 = vpop.f32.mrb[56].mxu1 }
 0x317   : > { %1528 = vrot.lane.b32.xlu1 %v3800_v46, %s4081_s26  ;;  %v4546_v51 = vadd.f32 %v3580_v50, %v4348_v38  ;;  %v1131_v54 = vpop.f32.mrb[57].mxu1  ;;  %3817 = vpow2.f32 %v1442_v52  ;;  %v1458_v52 = vmul.f32 1.442695, %v1406_v32 }
 0x318   : > { %v4550_v58 = vadd.f32 %v4348_v38, %v1131_v54  ;;  %v3581_v60 = vpop.f32.mrb[58].mxu1  ;;  %3819 = vpow2.f32 %v1444_v42  ;;  %v1405_v54 = vmul.f32 0.5, %v4497_v30 }
 0x319   : > { %1682 = vrot.lane.b32.xlu0 %v3802_v55, %s4080_s25  ;;  %1188 = vst.msk [vmem:[%s4354_s23 + $0xd0] sm:$0xff] %vm952_vm1, %v4546_v51  ;;  %v4557_v61 = vadd.f32 %v3581_v60, %v4348_v38  ;;  %v1134_v62 = vpop.f32.mrb[59].mxu1  ;;  %3821 = vpow2.f32 %v1454_v63 }
 0x31a   : > { %1186 = vst.msk [vmem:[%s4354_s23 + $0xc0] sm:$0xff] %vm952_vm1, %v4550_v58  ;;  %v4563_v4 = vadd.f32 %v4348_v38, %v1134_v62  ;;  %v1456_v60 = vmul.f32 1.442695, %v1405_v54  ;;  %v1402_v62 = vmul.f32 0.5, %v4489_v28 }
 0x31b   : > { %1684 = vrot.lane.b32.xlu1 %v3804_v1, %s4080_s25  ;;  %1189 = vst.msk [vmem:[%s4354_s23 + $0xd8] sm:$0xff] %vm952_vm1, %v4557_v61 }
 0x31c   : > { %1187 = vst.msk [vmem:[%s4354_s23 + $0xc8] sm:$0xff] %vm952_vm1, %v4563_v4  ;;  %3823 = vpow2.f32 %v1456_v60  ;;  %v1450_v2 = vmul.f32 1.442695, %v1402_v62  ;;  %v1412_v62 = vmul.f32 0.5, %v4546_v51  ;;  %v1411_v32 = vmul.f32 0.5, %v4563_v4 }
 0x31d   : > { %1522 = vrot.lane.b32.xlu0 %v3802_v55, %s4081_s26 }
 0x31e   : > { %v3584_v9 = vpop.f32.mrb[60].mxu1  ;;  %3825 = vpow2.f32 %v1450_v2 }
 0x31f   : > { %1524 = vrot.lane.b32.xlu1 %v3804_v1, %s4081_s26  ;;  %v4576_v10 = vadd.f32 %v3584_v9, %v4348_v38  ;;  %v1147_v11 = vpop.f32.mrb[61].mxu1  ;;  %v1403_v1 = vmul.f32 0.5, %v4503_v33 }
 0x320   : > { %v4580_v14 = vadd.f32 %v4348_v38, %v1147_v11  ;;  %v3585_v16 = vpop.f32.mrb[62].mxu1 }
 0x321   : > { %5329 = vst [vmem:[#allocation18_spill] sm:$0xff] %v4576_v10  ;;  %1286 = vrot.lane.b32.xlu0 %v4454_v12, %s4080_s25  ;;  %1192 = vst.msk [vmem:[%s4354_s23 + $0xf0] sm:$0xff] %vm952_vm1, %v4576_v10  ;;  %v4588_v18 = vadd.f32 %v3585_v16, %v4348_v38  ;;  %v1150_v19 = vpop.f32.mrb[63].mxu1  ;;  %v1452_v6 = vmul.f32 1.442695, %v1403_v1  ;;  %v1408_v16 = vmul.f32 0.5, %v4517_v36 }
 0x322   : > { %1190 = vst.msk [vmem:[%s4354_s23 + $0xe0] sm:$0xff] %vm952_vm1, %v4580_v14  ;;  %v4594_v22 = vadd.f32 %v4348_v38, %v1150_v19  ;;  %v3808_v38 = vpop.eup %3807 }
 0x323   : > { %5330 = vst [vmem:[#allocation19_spill] sm:$0xff] %v4588_v18  ;;  %1288 = vrot.lane.b32.xlu1 %v4465_v17, %s4080_s25  ;;  %1193 = vst.msk [vmem:[%s4354_s23 + $0xf8] sm:$0xff] %vm952_vm1, %v4588_v18  ;;  %v3810_v27 = vpop.eup %3809  ;;  %3827 = vpow2.f32 %v1452_v6  ;;  %v1462_v26 = vmul.f32 1.442695, %v1408_v16  ;;  %v1413_v6 = vmul.f32 0.5, %v4557_v61 }
 0x324   : > { %1191 = vst.msk [vmem:[%s4354_s23 + $0xe8] sm:$0xff] %vm952_vm1, %v4594_v22  ;;  %v3812_v31 = vpop.eup %3811  ;;  %v1470_v16 = vmul.f32 1.442695, %v1412_v62  ;;  %v1416_v62 = vmul.f32 0.5, %v4576_v10  ;;  %v1415_v17 = vmul.f32 0.5, %v4594_v22  ;;  %s3048_s23 = sshll.u32 %s5187_s16, 4  ;;  %s5241_s23 = int_to_ptr.vmem [resolvable:$true] %s3048_s23 }
 0x325   : > { %1282 = vrot.lane.b32.xlu0 %v4458_v15, %s4080_s25  ;;  %v3814_v45 = vpop.eup %3813  ;;  %3829 = vpow2.f32 %v1462_v26  ;;  %v1472_v23 = vmul.f32 1.442695, %v1413_v6  ;;  %v1410_v26 = vmul.f32 0.5, %v4550_v58  ;;  %s4009_s30 = scalar_lea.vmem %s5241_s23, 4096 }
 0x326   : > { %v3816_v46 = vpop.eup %3815  ;;  %3831 = vpow2.f32 %v1464_v29  ;;  %p4010_p6 = scmp.ne.s32.totalorder %s5241_s23, %s4009_s30 }
 0x327   : > { %1284 = vrot.lane.b32.xlu1 %v4471_v20, %s4080_s25  ;;  %v3818_v50 = vpop.eup %3817  ;;  %3833 = vpow2.f32 %v1458_v52  ;;  %v1466_v52 = vmul.f32 1.442695, %v1410_v26  ;;  %v1478_v26 = vmul.f32 1.442695, %v1416_v62 }
 0x328   : > { %v3820_v55 = vpop.eup %3819  ;;  %p4011_p10 = pnand %p4010_p6, %p5381_p9 }
 0x329   : > { %1694 = vrot.lane.b32.xlu0 %v3806_v24, %s4080_s25  ;;  %v3822_v8 = vpop.eup %3821 }
 0x32a   : > { %v3824_v9 = vpop.eup %3823  ;;  %p4012_p12 = pneg %p4011_p10 }
 0x32b   : > { %1696 = vrot.lane.b32.xlu1 %v3808_v38, %s4080_s25  ;;  %v3826_v21 = vpop.eup %3825 }
 0x32d   : > { %1534 = vrot.lane.b32.xlu0 %v3806_v24, %s4081_s26 }
 0x32f   : > { %1536 = vrot.lane.b32.xlu1 %v3808_v38, %s4081_s26  ;;  %v3828_v38 = vpop.eup %3827 }
 0x331   : > { %1690 = vrot.lane.b32.xlu0 %v3810_v27, %s4080_s25 }
 0x333   : > { %1692 = vrot.lane.b32.xlu1 %v3812_v31, %s4080_s25 }
 0x335   : > { %1530 = vrot.lane.b32.xlu0 %v3810_v27, %s4081_s26 }
 0x337   : > { %1532 = vrot.lane.b32.xlu1 %v3812_v31, %s4081_s26 }
 0x339   : > { %1294 = vrot.lane.b32.xlu0 %v4485_v25, %s4080_s25 }
 0x33b   : > { %1296 = vrot.lane.b32.xlu1 %v4497_v30, %s4080_s25 }
 0x33d   : > { %1290 = vrot.lane.b32.xlu0 %v4489_v28, %s4080_s25 }
 0x33f   : > { %1292 = vrot.lane.b32.xlu1 %v4503_v33, %s4080_s25 }
 0x341   : > { %1702 = vrot.lane.b32.xlu0 %v3814_v45, %s4080_s25 }
 0x343   : > { %1704 = vrot.lane.b32.xlu1 %v3816_v46, %s4080_s25 }
 0x345   : > { %1542 = vrot.lane.b32.xlu0 %v3814_v45, %s4081_s26  ;;  %v1460_v45 = vmul.f32 1.442695, %v1407_v35 }
 0x347   : > { %1544 = vrot.lane.b32.xlu1 %v3816_v46, %s4081_s26  ;;  %3835 = vpow2.f32 %v1460_v45 }
 0x348   : > { %3837 = vpow2.f32 %v1470_v16 }
 0x349   : > { %1698 = vrot.lane.b32.xlu0 %v3818_v50, %s4080_s25  ;;  %3839 = vpow2.f32 %v1472_v23 }
 0x34a   : > { %3841 = vpow2.f32 %v1466_v52 }
 0x34b   : > { %1700 = vrot.lane.b32.xlu1 %v3820_v55, %s4080_s25 }
 0x34d   : > { %1538 = vrot.lane.b32.xlu0 %v3818_v50, %s4081_s26  ;;  %v3830_v50 = vpop.eup %3829 }
 0x34f   : > { %1540 = vrot.lane.b32.xlu1 %v3820_v55, %s4081_s26  ;;  %v3832_v55 = vpop.eup %3831 }
 0x350   : > { %v3834_v2 = vpop.eup %3833 }
 0x351   : > { %1302 = vrot.lane.b32.xlu0 %v4517_v36, %s4080_s25 }
 0x353   : > { %1304 = vrot.lane.b32.xlu1 %v4527_v43, %s4080_s25 }
 0x355   : > { %1298 = vrot.lane.b32.xlu0 %v4520_v40, %s4080_s25 }
 0x357   : > { %1300 = vrot.lane.b32.xlu1 %v4533_v48, %s4080_s25 }
 0x359   : > { %1710 = vrot.lane.b32.xlu0 %v3822_v8, %s4080_s25 }
 0x35b   : > { %v4649_v11 = vpop.permute.xlu0 %1262  ;;  %1712 = vrot.lane.b32.xlu1 %v3824_v9, %s4080_s25 }
 0x35d   : > { %v4652_v13 = vpop.permute.xlu1 %1264  ;;  %1550 = vrot.lane.b32.xlu0 %v3822_v8, %s4081_s26 }
 0x35f   : > { %1552 = vrot.lane.b32.xlu1 %v3824_v9, %s4081_s26  ;;  %v4657_v19 = vpop.permute.xlu0 %1258  ;;  %v3836_v9 = vpop.eup %3835 }
 0x360   : > { %v3838_v6 = vpop.eup %3837 }
 0x361   : > { %v4660_v24 = vpop.permute.xlu1 %1260  ;;  %1706 = vrot.lane.b32.xlu0 %v3826_v21, %s4080_s25  ;;  %v3840_v23 = vpop.eup %3839 }
 0x362   : > { %v3842_v62 = vpop.eup %3841 }
 0x363   : > { %1708 = vrot.lane.b32.xlu1 %v3828_v38, %s4080_s25  ;;  %v4664_v27 = vpop.permute.xlu0 %1270 }
 0x364   : > { %5331 = vst [vmem:[#allocation20_spill] sm:$0xff] %v4664_v27 }
 0x365   : > { %v4666_v31 = vpop.permute.xlu1 %1272  ;;  %1546 = vrot.lane.b32.xlu0 %v3826_v21, %s4081_s26 }
 0x366   : > { %5332 = vst [vmem:[#allocation21_spill] sm:$0xff] %v4666_v31 }
 0x367   : > { %1548 = vrot.lane.b32.xlu1 %v3828_v38, %s4081_s26  ;;  %v4671_v34 = vpop.permute.xlu0 %1266 }
 0x368   : > { %5333 = vst [vmem:[#allocation22_spill] sm:$0xff] %v4671_v34  ;;  %v4807_v34 = vld [vmem:[%s4777_s7 + $0x8] sm:$0xff] }
 0x369   : > { %v4674_v37 = vpop.permute.xlu1 %1268  ;;  %1310 = vrot.lane.b32.xlu0 %v4546_v51, %s4080_s25 }
 0x36a   : > { %5334 = vst [vmem:[#allocation23_spill] sm:$0xff] %v4674_v37 }
 0x36b   : > { %1312 = vrot.lane.b32.xlu1 %v4557_v61, %s4080_s25  ;;  %v4680_v42 = vpop.permute.xlu0 %1518 }
 0x36d   : > { %v4682_v46 = vpop.permute.xlu1 %1678  ;;  %1306 = vrot.lane.b32.xlu0 %v4550_v58, %s4080_s25 }
 0x36e   : > { %v1772_v37 = vmul.f32 %v4682_v46, %v4786_v5 }
 0x36f   : > { %1308 = vrot.lane.b32.xlu1 %v4563_v4, %s4080_s25  ;;  %v4688_v49 = vpop.permute.xlu0 %1674 }
 0x371   : > { %v4690_v54 = vpop.permute.xlu1 %1680  ;;  %1718 = vrot.lane.b32.xlu0 %v3830_v50, %s4080_s25 }
 0x373   : > { %1720 = vrot.lane.b32.xlu1 %v3832_v55, %s4080_s25  ;;  %v4694_v63 = vpop.permute.xlu0 %1514 }
 0x375   : > { %v4696_v60 = vpop.permute.xlu1 %1520  ;;  %1558 = vrot.lane.b32.xlu0 %v3830_v50, %s4081_s26  ;;  %v1468_v50 = vmul.f32 1.442695, %v1411_v32  ;;  %v1414_v32 = vmul.f32 0.5, %v4580_v14 }
 0x377   : > { %1560 = vrot.lane.b32.xlu1 %v3832_v55, %s4081_s26  ;;  %v4701_v1 = vpop.permute.xlu0 %1278  ;;  %3843 = vpow2.f32 %v1468_v50  ;;  %v1474_v50 = vmul.f32 1.442695, %v1414_v32 }
 0x378   : > { %5335 = vst [vmem:[#allocation24_spill] sm:$0xff] %v4701_v1  ;;  %3845 = vpow2.f32 %v1478_v26  ;;  %v4789_v1 = vld [vmem:[%s4777_s7 + $0x18] sm:$0xff] }
 0x379   : > { %v4704_v8 = vpop.permute.xlu1 %1516  ;;  %1714 = vrot.lane.b32.xlu0 %v3834_v2, %s4080_s25 }
 0x37b   : > { %1716 = vrot.lane.b32.xlu1 %v3836_v9, %s4080_s25  ;;  %v4708_v21 = vpop.permute.xlu0 %1274 }
 0x37c   : > { %5336 = vst [vmem:[#allocation25_spill] sm:$0xff] %v4708_v21 }
 0x37d   : > { %v4710_v38 = vpop.permute.xlu1 %1280  ;;  %1554 = vrot.lane.b32.xlu0 %v3834_v2, %s4081_s26 }
 0x37e   : > { %5337 = vst [vmem:[#allocation26_spill] sm:$0xff] %v4710_v38 }
 0x37f   : > { %1556 = vrot.lane.b32.xlu1 %v3836_v9, %s4081_s26  ;;  %v4715_v29 = vpop.permute.xlu0 %1676  ;;  %v1417_v9 = vmul.f32 0.5, %v4588_v18 }
 0x381   : > { %v4718_v35 = vpop.permute.xlu1 %1276  ;;  %1318 = vrot.lane.b32.xlu0 %v4576_v10, %s4080_s25  ;;  %v1480_v10 = vmul.f32 1.442695, %v1417_v9  ;;  %v3844_v9 = vpop.eup %3843 }
 0x382   : > { %5338 = vst [vmem:[#allocation27_spill] sm:$0xff] %v4718_v35  ;;  %v1476_v35 = vmul.f32 1.442695, %v1415_v17 }
 0x383   : > { %1320 = vrot.lane.b32.xlu1 %v4588_v18, %s4080_s25  ;;  %v4724_v45 = vpop.permute.xlu0 %1686  ;;  %3847 = vpow2.f32 %v1480_v10  ;;  %v4762_v10 = vpop.eup %3845 }
 0x384   : > { %3849 = vpow2.f32 %v1474_v50 }
 0x385   : > { %v4726_v55 = vpop.permute.xlu1 %1688  ;;  %1314 = vrot.lane.b32.xlu0 %v4580_v14, %s4080_s25  ;;  %3851 = vpow2.f32 %v1476_v35 }
 0x387   : > { %1316 = vrot.lane.b32.xlu1 %v4594_v22, %s4080_s25  ;;  %v4733_v2 = vpop.permute.xlu0 %1526 }
 0x389   : > { %v4736_v16 = vpop.permute.xlu1 %1528  ;;  %1726 = vrot.lane.b32.xlu0 %v3838_v6, %s4080_s25 }
 0x38b   : > { %1728 = vrot.lane.b32.xlu1 %v3840_v23, %s4080_s25  ;;  %v4741_v52 = vpop.permute.xlu0 %1682 }
 0x38d   : > { %v4744_v12 = vpop.permute.xlu1 %1684  ;;  %1566 = vrot.lane.b32.xlu0 %v3838_v6, %s4081_s26  ;;  %v4768_v35 = vpop.eup %3847 }
 0x38e   : > { %v3850_v50 = vpop.eup %3849 }
 0x38f   : > { %1568 = vrot.lane.b32.xlu1 %v3840_v23, %s4081_s26  ;;  %v4748_v18 = vpop.permute.xlu0 %1522  ;;  %v3778_v23 = vld [vmem:[#allocation2 + $0x90] sm:$0xff]  }
 0x390   : > { %5339 = vst [vmem:[#allocation28_spill] sm:$0xff] %v4748_v18  ;;  %3586 = vmatprep.subr.bf16.mxu0 %v3778_v23 }
 0x391   : > { %v4750_v7 = vpop.permute.xlu1 %1524  ;;  %1722 = vrot.lane.b32.xlu0 %v3842_v62, %s4080_s25  ;;  %3587 = vmatpush3.bf16.msra.mxu0 %v3778_v23  ;;  %v1204_v23 = vld [vmem:[%s4777_s7 + $0x50] sm:$0xff] }
 0x392   : > { %5340 = vst [vmem:[#allocation29_spill] sm:$0xff] %v4750_v7  ;;  %v1203_v7 = vld [vmem:[%s4777_s7 + $0x48] sm:$0xff] }
 0x393   : > { %1724 = vrot.lane.b32.xlu1 %v3844_v9, %s4080_s25  ;;  %v4754_v21 = vpop.permute.xlu0 %1286 }
 0x394   : > { %5341 = vst [vmem:[#allocation30_spill] sm:$0xff] %v4754_v21 }
 0x395   : > { %v4756_v6 = vpop.permute.xlu1 %1288  ;;  %1562 = vrot.lane.b32.xlu0 %v3842_v62, %s4081_s26 }
 0x396   : > { %5342 = vst [vmem:[#allocation31_spill] sm:$0xff] %v4756_v6 }
 0x397   : > { %1564 = vrot.lane.b32.xlu1 %v3844_v9, %s4081_s26  ;;  %v4760_v17 = vpop.permute.xlu0 %1282  ;;  %v3852_v9 = vpop.eup %3851 }
 0x399   : > { %v4764_v26 = vpop.permute.xlu1 %1284  ;;  %1734 = vrot.lane.b32.xlu0 %v4762_v10, %s4080_s25 }
 0x39b   : > { %1736 = vrot.lane.b32.xlu1 %v4768_v35, %s4080_s25  ;;  %v1695_v32 = vpop.permute.xlu0 %1694 }
 0x39d   : > { %v1697_v62 = vpop.permute.xlu1 %1696  ;;  %1730 = vrot.lane.b32.xlu0 %v3850_v50, %s4080_s25 }
 0x39f   : > { %1732 = vrot.lane.b32.xlu1 %v3852_v9, %s4080_s25  ;;  %v1535_v6 = vpop.permute.xlu0 %1534 }
 0x3a0   : > { %v4781_v21 = vmul.f32 %v1535_v6, %v1204_v23 }
 0x3a1   : > { %v1537_v38 = vpop.permute.xlu1 %1536  ;;  %1570 = vrot.lane.b32.xlu0 %v3850_v50, %s4081_s26  ;;  %v1773_v50 = vmul.f32 %v4690_v54, %v4789_v1  ;;  %v1771_v54 = vmul.f32 %v4715_v29, %v4807_v34 }
 0x3a2   : > { %5343 = vst [vmem:[#allocation32_spill] sm:$0xff] %v4781_v21  ;;  %v4791_v0 = vmul.f32 %v1537_v38, %v1205_v3  ;;  %v4797_v21 = vld [vmem:[%s4777_s7] sm:$0xff] }
 0x3a3   : > { %1572 = vrot.lane.b32.xlu1 %v3852_v9, %s4081_s26  ;;  %v1691_v6 = vpop.permute.xlu0 %1690  ;;  %v1770_v38 = vmul.f32 %v4688_v49, %v4797_v21  ;;  %v4810_v9 = vld [vmem:[%s4777_s7 + $0x30] sm:$0xff]  ;;  %v4819_v49 = vld [vmem:[%s4777_s7 + $0x38] sm:$0xff] }
 0x3a4   : > { %5344 = vst [vmem:[#allocation33_spill] sm:$0xff] %v4791_v0  ;;  %v1202_v0 = vld [vmem:[%s4777_s7 + $0x40] sm:$0xff] }
 0x3a5   : > { %v1693_v59 = vpop.permute.xlu1 %1692  ;;  %1838 = vrot.lane.b32.xlu0 %v1772_v37, %s4081_s26 }
 0x3a7   : > { %1840 = vrot.lane.b32.xlu1 %v1773_v50, %s4081_s26  ;;  %v1531_v46 = vpop.permute.xlu0 %1530  ;;  %v1776_v50 = vmul.f32 %v4724_v45, %v4810_v9 }
 0x3a8   : > { %v4812_v56 = vmul.f32 %v1531_v46, %v1202_v0  ;;  %v1777_v46 = vmul.f32 %v4726_v55, %v4819_v49  ;;  %v1780_v55 = vmul.f32 %v1695_v32, %v1204_v23  ;;  %v1206_v23 = vld [vmem:[%s4777_s7 + $0x60] sm:$0xff] }
 0x3a9   : > { %v1533_v37 = vpop.permute.xlu1 %1532  ;;  %1834 = vrot.lane.b32.xlu0 %v1770_v38, %s4081_s26  ;;  %v4835_v38 = vld [vmem:[%s4777_s7 + $0x28] sm:$0xff] }
 0x3aa   : > { %5345 = vst [vmem:[#allocation34_spill] sm:$0xff] %v4812_v56  ;;  %v4821_v18 = vmul.f32 %v1533_v37, %v1203_v7  ;;  %5348 = vst [vmem:[#allocation37_spill] sm:$0xff] %v4835_v38  ;;  %v1774_v37 = vmul.f32 %v4741_v52, %v4827_v57  ;;  %v1781_v56 = vmul.f32 %v1697_v62, %v1205_v3 }
 0x3ab   : > { %1836 = vrot.lane.b32.xlu1 %v1771_v54, %s4081_s26  ;;  %v1295_v31 = vpop.permute.xlu0 %1294  ;;  %v1775_v54 = vmul.f32 %v4744_v12, %v4835_v38  ;;  %v1778_v52 = vmul.f32 %v1691_v6, %v1202_v0  ;;  %v1779_v38 = vmul.f32 %v1693_v59, %v1203_v7  ;;  %v1366_v59 = vadd.f32 %v4760_v17, %v4458_v15 }
 0x3ac   : > { %5346 = vst [vmem:[#allocation35_spill] sm:$0xff] %v4821_v18 }
 0x3ad   : > { %v4831_v29 = vpop.permute.xlu1 %1296  ;;  %1846 = vrot.lane.b32.xlu0 %v1776_v50, %s4081_s26 }
 0x3af   : > { %1848 = vrot.lane.b32.xlu1 %v1777_v46, %s4081_s26  ;;  %v4840_v45 = vpop.permute.xlu0 %1290  ;;  %v1208_v46 = vld [vmem:[%s4777_s7 + $0x70] sm:$0xff] }
 0x3b1   : > { %v4844_v18 = vpop.permute.xlu1 %1292  ;;  %1842 = vrot.lane.b32.xlu0 %v1774_v37, %s4081_s26 }
 0x3b3   : > { %1844 = vrot.lane.b32.xlu1 %v1775_v54, %s4081_s26  ;;  %v1703_v50 = vpop.permute.xlu0 %1702 }
 0x3b4   : > { %v1784_v3 = vmul.f32 %v1703_v50, %v1208_v46 }
 0x3b5   : > { %v1705_v27 = vpop.permute.xlu1 %1704  ;;  %1854 = vrot.lane.b32.xlu0 %v1780_v55, %s4081_s26 }
 0x3b6   : > { %v1785_v0 = vmul.f32 %v1705_v27, %v1209_v53 }
 0x3b7   : > { %1856 = vrot.lane.b32.xlu1 %v1781_v56, %s4081_s26  ;;  %v1543_v57 = vpop.permute.xlu0 %1542  ;;  %v1207_v56 = vld [vmem:[%s4777_s7 + $0x68] sm:$0xff] }
 0x3b8   : > { %v4851_v12 = vmul.f32 %v1543_v57, %v1208_v46 }
 0x3b9   : > { %v1545_v37 = vpop.permute.xlu1 %1544  ;;  %1850 = vrot.lane.b32.xlu0 %v1778_v52, %s4081_s26 }
 0x3ba   : > { %v4855_v32 = vmul.f32 %v1545_v37, %v1209_v53  ;;  %v1367_v53 = vadd.f32 %v4764_v26, %v4471_v20 }
 0x3bb   : > { %1852 = vrot.lane.b32.xlu1 %v1779_v38, %s4081_s26  ;;  %v1699_v62 = vpop.permute.xlu0 %1698 }
 0x3bc   : > { %v1782_v54 = vmul.f32 %v1699_v62, %v1206_v23 }
 0x3bd   : > { %v1701_v6 = vpop.permute.xlu1 %1700  ;;  %1862 = vrot.lane.b32.xlu0 %v1784_v3, %s4081_s26  ;;  %v1212_v3 = vld [vmem:[%s4777_s7 + $0x90] sm:$0xff] }
 0x3be   : > { %v1783_v55 = vmul.f32 %v1701_v6, %v1207_v56 }
 0x3bf   : > { %1864 = vrot.lane.b32.xlu1 %v1785_v0, %s4081_s26  ;;  %v1539_v57 = vpop.permute.xlu0 %1538 }
 0x3c0   : > { %v1622_v7 = vmul.f32 %v1539_v57, %v1206_v23  ;;  %v1213_v23 = vld [vmem:[%s4777_s7 + $0x98] sm:$0xff] }
 0x3c1   : > { %v1541_v50 = vpop.permute.xlu1 %1540  ;;  %1858 = vrot.lane.b32.xlu0 %v1782_v54, %s4081_s26 }
 0x3c2   : > { %v1623_v27 = vmul.f32 %v1541_v50, %v1207_v56  ;;  %v4867_v38 = vadd.f32 %v1622_v7, %v1366_v59  ;;  %v1372_v56 = vadd.f32 %v1295_v31, %v4485_v25  ;;  %v1210_v59 = vld [vmem:[%s4777_s7 + $0x80] sm:$0xff]  ;;  %v1373_v7 = vadd.f32 %v4831_v29, %v4497_v30 }
 0x3c3   : > { %1860 = vrot.lane.b32.xlu1 %v1783_v55, %s4081_s26  ;;  %v1303_v52 = vpop.permute.xlu0 %1302  ;;  %v1370_v31 = vadd.f32 %v4840_v45, %v4489_v28  ;;  %v1371_v29 = vadd.f32 %v4844_v18, %v4503_v33  ;;  %v1217_v45 = vld [vmem:[%s4777_s7 + $0xb8] sm:$0xff] }
 0x3c4   : > { %v4870_v46 = vadd.f32 %v1623_v27, %v1367_v53  ;;  %v1211_v27 = vld [vmem:[%s4777_s7 + $0x88] sm:$0xff]  ;;  %v1376_v18 = vadd.f32 %v1303_v52, %v4517_v36 }
 0x3c5   : > { %v1305_v37 = vpop.permute.xlu1 %1304 }
 0x3c6   : > { %5349 = vst [vmem:[#allocation38_spill] sm:$0xff] %v4870_v46 }
 0x3c7   : > { %v1299_v15 = vpop.permute.xlu0 %1298 }
 0x3c8   : > { %v1374_v52 = vadd.f32 %v1299_v15, %v4520_v40  ;;  %v1220_v40 = vld [vmem:[%s4777_s7 + $0xd0] sm:$0xff] }
 0x3c9   : > { %v4872_v17 = vpop.permute.xlu1 %1300 }
 0x3cb   : > { %v1711_v62 = vpop.permute.xlu0 %1710 }
 0x3cc   : > { %v1788_v0 = vmul.f32 %v1711_v62, %v1212_v3 }
 0x3cd   : > { %v1713_v6 = vpop.permute.xlu1 %1712 }
 0x3ce   : > { %v1789_v20 = vmul.f32 %v1713_v6, %v1213_v23  ;;  %1870 = vrot.lane.b32.xlu0 %v1788_v0, %s4081_s26 }
 0x3cf   : > { %v1551_v26 = vpop.permute.xlu0 %1550 }
 0x3d0   : > { %v1628_v54 = vmul.f32 %v1551_v26, %v1212_v3  ;;  %1872 = vrot.lane.b32.xlu1 %v1789_v20, %s4081_s26 }
 0x3d1   : > { %v1553_v57 = vpop.permute.xlu1 %1552 }
 0x3d2   : > { %v1629_v55 = vmul.f32 %v1553_v57, %v1213_v23  ;;  %v4882_v50 = vadd.f32 %v1628_v54, %v1372_v56 }
 0x3d3   : > { %v1707_v53 = vpop.permute.xlu0 %1706 }
 0x3d4   : > { %v1786_v62 = vmul.f32 %v1707_v53, %v1210_v59  ;;  %v4885_v6 = vadd.f32 %v1629_v55, %v1373_v7  ;;  %v1216_v55 = vld [vmem:[%s4777_s7 + $0xb0] sm:$0xff] }
 0x3d5   : > { %v1709_v0 = vpop.permute.xlu1 %1708 }
 0x3d6   : > { %v1787_v46 = vmul.f32 %v1709_v0, %v1211_v27  ;;  %1866 = vrot.lane.b32.xlu0 %v1786_v62, %s4081_s26  ;;  %v1214_v0 = vld [vmem:[%s4777_s7 + $0xa0] sm:$0xff] }
 0x3d7   : > { %v1547_v25 = vpop.permute.xlu0 %1546 }
 0x3d8   : > { %v1626_v3 = vmul.f32 %v1547_v25, %v1210_v59  ;;  %1868 = vrot.lane.b32.xlu1 %v1787_v46, %s4081_s26  ;;  %v1377_v25 = vadd.f32 %v1305_v37, %v4527_v43  ;;  %v1375_v37 = vadd.f32 %v4872_v17, %v4533_v48 }
 0x3d9   : > { %v1549_v30 = vpop.permute.xlu1 %1548 }
 0x3da   : > { %v1627_v23 = vmul.f32 %v1549_v30, %v1211_v27  ;;  %v4893_v20 = vadd.f32 %v1626_v3, %v1370_v31 }
 0x3db   : > { %v1311_v26 = vpop.permute.xlu0 %1310 }
 0x3dc   : > { %v4895_v56 = vadd.f32 %v1627_v23, %v1371_v29  ;;  %v1215_v29 = vld [vmem:[%s4777_s7 + $0xa8] sm:$0xff]  ;;  %v1380_v17 = vadd.f32 %v1311_v26, %v4546_v51 }
 0x3dd   : > { %v1313_v54 = vpop.permute.xlu1 %1312 }
 0x3df   : > { %v1307_v57 = vpop.permute.xlu0 %1306 }
 0x3e0   : > { %v1378_v26 = vadd.f32 %v1307_v57, %v4550_v58 }
 0x3e1   : > { %v4897_v7 = vpop.permute.xlu1 %1308 }
 0x3e3   : > { %v1719_v28 = vpop.permute.xlu0 %1718 }
 0x3e4   : > { %v1792_v46 = vmul.f32 %v1719_v28, %v1216_v55 }
 0x3e5   : > { %v1721_v59 = vpop.permute.xlu1 %1720 }
 0x3e6   : > { %v1793_v53 = vmul.f32 %v1721_v59, %v1217_v45  ;;  %1878 = vrot.lane.b32.xlu0 %v1792_v46, %s4081_s26 }
 0x3e7   : > { %v1559_v33 = vpop.permute.xlu0 %1558 }
 0x3e8   : > { %v1632_v27 = vmul.f32 %v1559_v33, %v1216_v55  ;;  %1880 = vrot.lane.b32.xlu1 %v1793_v53, %s4081_s26 }
 0x3e9   : > { %v1561_v62 = vpop.permute.xlu1 %1560 }
 0x3ea   : > { %v1633_v31 = vmul.f32 %v1561_v62, %v1217_v45  ;;  %v4906_v3 = vadd.f32 %v1632_v27, %v1376_v18 }
 0x3eb   : > { %v1715_v30 = vpop.permute.xlu0 %1714 }
 0x3ec   : > { %v1790_v23 = vmul.f32 %v1715_v30, %v1214_v0  ;;  %v4909_v28 = vadd.f32 %v1633_v31, %v1377_v25 }
 0x3ed   : > { %v1717_v59 = vpop.permute.xlu1 %1716 }
 0x3ee   : > { %v1791_v46 = vmul.f32 %v1717_v59, %v1215_v29  ;;  %1874 = vrot.lane.b32.xlu0 %v1790_v23, %s4081_s26 }
 0x3ef   : > { %v1555_v36 = vpop.permute.xlu0 %1554 }
 0x3f0   : > { %v1630_v55 = vmul.f32 %v1555_v36, %v1214_v0  ;;  %1876 = vrot.lane.b32.xlu1 %v1791_v46, %s4081_s26  ;;  %v1221_v0 = vld [vmem:[%s4777_s7 + $0xd8] sm:$0xff]  ;;  %v1218_v46 = vld [vmem:[%s4777_s7 + $0xc0] sm:$0xff]  ;;  %v1381_v36 = vadd.f32 %v1313_v54, %v4557_v61  ;;  %v1379_v54 = vadd.f32 %v4897_v7, %v4563_v4  ;;  %v4952_v7 = vld [vmem:[%s4777_s7 + $0xf0] sm:$0xff] }
 0x3f1   : > { %v1557_v43 = vpop.permute.xlu1 %1556 }
 0x3f2   : > { %v1631_v45 = vmul.f32 %v1557_v43, %v1215_v29  ;;  %v4916_v53 = vadd.f32 %v1630_v55, %v1374_v52 }
 0x3f3   : > { %v4918_v33 = vpop.permute.xlu0 %1318 }
 0x3f4   : > { %v4920_v18 = vadd.f32 %v1631_v45, %v1375_v37  ;;  %v1219_v37 = vld [vmem:[%s4777_s7 + $0xc8] sm:$0xff] }
 0x3f5   : > { %v4922_v27 = vpop.permute.xlu1 %1320 }
 0x3f7   : > { %v1315_v62 = vpop.permute.xlu0 %1314 }
 0x3f9   : > { %v1317_v25 = vpop.permute.xlu1 %1316 }
 0x3fb   : > { %v1727_v15 = vpop.permute.xlu0 %1726 }
 0x3fc   : > { %v1796_v31 = vmul.f32 %v1727_v15, %v1220_v40 }
 0x3fd   : > { %v1729_v30 = vpop.permute.xlu1 %1728 }
 0x3fe   : > { %v1797_v23 = vmul.f32 %v1729_v30, %v1221_v0  ;;  %1886 = vrot.lane.b32.xlu0 %v1796_v31, %s4081_s26 }
 0x3ff   : > { %v1567_v48 = vpop.permute.xlu0 %1566 }
 0x400   : > { %v1636_v29 = vmul.f32 %v1567_v48, %v1220_v40  ;;  %1888 = vrot.lane.b32.xlu1 %v1797_v23, %s4081_s26 }
 0x401   : > { %v1569_v59 = vpop.permute.xlu1 %1568 }
 0x402   : > { %v1637_v52 = vmul.f32 %v1569_v59, %v1221_v0  ;;  %v4931_v55 = vadd.f32 %v1636_v29, %v1380_v17  ;;  %v1222_v17 = vld [vmem:[%s4777_s7 + $0xe0] sm:$0xff]  ;;  %v1223_v59 = vld [vmem:[%s4777_s7 + $0xe8] sm:$0xff] }
 0x403   : > { %v1723_v43 = vpop.permute.xlu0 %1722 }
 0x404   : > { %v1794_v45 = vmul.f32 %v1723_v43, %v1218_v46  ;;  %v4934_v15 = vadd.f32 %v1637_v52, %v1381_v36  ;;  %v3780_v36 = vld [vmem:[#allocation2 + $0xa0] sm:$0xff]   ;;  %v4958_v43 = vld [vmem:[%s4777_s7 + $0xf8] sm:$0xff]  ;;  %s4082_s7 = smov [#allocation5]  }
 0x405   : > { %v1725_v30 = vpop.permute.xlu1 %1724  ;;  %s4013_s8 = sshll.u32 %s4082_s7, 4  ;;  %s4014_s8 = int_to_ptr.vmem [resolvable:$false] %s4013_s8 }
 0x406   : > { %v1795_v31 = vmul.f32 %v1725_v30, %v1219_v37  ;;  %1882 = vrot.lane.b32.xlu0 %v1794_v45, %s4081_s26  ;;  %v1613_v45 = vmul.f32 %v4696_v60, %v4789_v1  ;;  %v1382_v30 = vadd.f32 %v1315_v62, %v4580_v14  ;;  %v1610_v62 = vmul.f32 %v4694_v63, %v4797_v21  ;;  %s4015_s9 = scalar_lea.vmem %s4014_s8, 8192  ;;  %p4016_p2 = scmp.lt.s32.totalorder %s5241_s23, %s4014_s8 }
 0x407   : > { %v1563_v51 = vpop.permute.xlu0 %1562  ;;  %v1616_v63 = vmul.f32 %v4733_v2, %v4810_v9  ;;  %v5354_v2 = vld [vmem:[#allocation36_spill] sm:$0xff]  ;;  %p4017_p3 = scmp.lt.s32.totalorder %s4015_s9, %s4009_s30 }
 0x408   : > { %v1634_v40 = vmul.f32 %v1563_v51, %v1218_v46  ;;  %1884 = vrot.lane.b32.xlu1 %v1795_v31, %s4081_s26  ;;  %v3779_v46 = vld [vmem:[#allocation2 + $0x98] sm:$0xff]   ;;  %v5355_v9 = vld [vmem:[#allocation28_spill] sm:$0xff] }
 0x409   : > { %v1565_v61 = vpop.permute.xlu1 %1564  ;;  %3620 = vmatprep.subr.bf16.mxu1 %v3779_v46  ;;  %p4018_p4 = por %p4017_p3, %p4016_p2 }
 0x40a   : > { %v1635_v0 = vmul.f32 %v1565_v61, %v1219_v37  ;;  %1574 = vrot.lane.b32.xlu0 %v4762_v10, %s4081_s26  ;;  %v4943_v23 = vadd.f32 %v1634_v40, %v1378_v26  ;;  %3621 = vmatpush3.bf16.msra.mxu1 %v3779_v46  ;;  %v1356_v26 = vadd.f32 %v4649_v11, %v4357_v39 }
 0x40b   : > { %v1735_v48 = vpop.permute.xlu0 %1734  ;;  %3622 = vmatprep.subr.bf16.mxu1 %v3780_v36  ;;  %v1611_v39 = vmul.f32 %v4704_v8, %v4807_v34  ;;  %v1617_v34 = vmul.f32 %v4736_v16, %v4819_v49  ;;  %v5357_v16 = vld [vmem:[#allocation29_spill] sm:$0xff]  ;;  %p4019_p7 = pnand %p4018_p4, %p4012_p12 }
 0x40c   : > { %1576 = vrot.lane.b32.xlu1 %v4768_v35, %s4081_s26  ;;  %v4947_v58 = vadd.f32 %v1635_v0, %v1379_v54  ;;  %v1612_v35 = vmul.f32 %v4680_v42, %v4786_v5  ;;  %v1800_v31 = vmul.f32 %v1735_v48, %v4952_v7  ;;  %v1357_v5 = vadd.f32 %v4652_v13, %v4367_v44 }
 0x40d   : > { %v1737_v57 = vpop.permute.xlu1 %1736  ;;  %v1383_v42 = vadd.f32 %v1317_v25, %v4594_v22  ;;  %v1354_v13 = vadd.f32 %v4657_v19, %v4360_v41  ;;  %v1355_v25 = vadd.f32 %v4660_v24, %v4376_v47  ;;  %v5352_v41 = vld [vmem:[#allocation10_spill] sm:$0xff]  ;;  %v5353_v19 = vld [vmem:[#allocation21_spill] sm:$0xff] }
 0x40e   : > { %v1801_v61 = vmul.f32 %v1737_v57, %v4958_v43  ;;  %3623 = vmatpush3.bf16.msra.mxu1 %v3780_v36  ;;  %v1644_v60 = vadd.f32 %v1612_v35, %v1356_v26  ;;  %v1645_v44 = vadd.f32 %v1613_v45, %v1357_v5  ;;  %v1614_v35 = vmul.f32 %v5355_v9, %v5354_v2  ;;  %v5359_v26 = vld [vmem:[#allocation22_spill] sm:$0xff] }
 0x40f   : > { %v1731_v29 = vpop.permute.xlu0 %1730  ;;  %v1642_v57 = vadd.f32 %v1610_v62, %v1354_v13  ;;  %v5362_v13 = vld [vmem:[#allocation12_spill] sm:$0xff] }
 0x410   : > { %v1798_v4 = vmul.f32 %v1731_v29, %v1222_v17  ;;  %v5350_v29 = vld [vmem:[#allocation8_spill] sm:$0xff] }
 0x411   : > { %v1733_v52 = vpop.permute.xlu1 %1732 }
 0x412   : > { %v1799_v10 = vmul.f32 %v1733_v52, %v1223_v59  ;;  %1890 = vrot.lane.b32.xlu0 %v1798_v4, %s4081_s26  ;;  %v1361_v4 = vadd.f32 %v5353_v19, %v5352_v41  ;;  %v5368_v19 = vld [vmem:[#allocation13_spill] sm:$0xff] }
 0x413   : > { %v1571_v37 = vpop.permute.xlu0 %1570 }
 0x414   : > { %v1638_v51 = vmul.f32 %v1571_v37, %v1222_v17  ;;  %1892 = vrot.lane.b32.xlu1 %v1799_v10, %s4081_s26  ;;  %v1643_v17 = vadd.f32 %v1611_v39, %v1355_v25  ;;  %v5356_v37 = vld [vmem:[#allocation37_spill] sm:$0xff]  ;;  %v5363_v25 = vld [vmem:[#allocation24_spill] sm:$0xff] }
 0x415   : > { %v1573_v40 = vpop.permute.xlu1 %1572  ;;  %v1615_v49 = vmul.f32 %v5357_v16, %v5356_v37  ;;  %v5372_v16 = vld [vmem:[#allocation34_spill] sm:$0xff] }
 0x416   : > { %v1639_v54 = vmul.f32 %v1573_v40, %v1223_v59  ;;  %1894 = vrot.lane.b32.xlu0 %v1800_v31, %s4081_s26  ;;  %v4972_v14 = vadd.f32 %v1638_v51, %v1382_v30  ;;  %v5351_v59 = vld [vmem:[#allocation20_spill] sm:$0xff]  ;;  %v1649_v30 = vadd.f32 %v1617_v34, %v1361_v4  ;;  %v5358_v51 = vld [vmem:[#allocation9_spill] sm:$0xff]  ;;  %v5361_v40 = vld [vmem:[#allocation23_spill] sm:$0xff] }
 0x417   : > { %v1839_v1 = vpop.permute.xlu0 %1838  ;;  %v1360_v46 = vadd.f32 %v5351_v59, %v5350_v29  ;;  %v1358_v5 = vadd.f32 %v5359_v26, %v5358_v51  ;;  %v5366_v59 = vld [vmem:[#allocation32_spill] sm:$0xff]  ;;  %v5369_v4 = vld [vmem:[#allocation25_spill] sm:$0xff]  ;;  %v5375_v26 = vld [vmem:[#allocation30_spill] sm:$0xff] }
 0x418   : > { %1896 = vrot.lane.b32.xlu1 %v1801_v61, %s4081_s26  ;;  %v4979_v22 = vadd.f32 %v1639_v54, %v1383_v42  ;;  %v1932_v0 = vadd.f32 %v1839_v1, %v1644_v60  ;;  %v5360_v42 = vld [vmem:[#allocation11_spill] sm:$0xff]  ;;  %v5374_v51 = vld [vmem:[#allocation16_spill] sm:$0xff] }
 0x419   : > { %v1841_v11 = vpop.permute.xlu1 %1840  ;;  %v1648_v52 = vadd.f32 %v1616_v63, %v1360_v46  ;;  %v1359_v61 = vadd.f32 %v5361_v40, %v5360_v42  ;;  %v1646_v39 = vadd.f32 %v1614_v35, %v1358_v5  ;;  %v5365_v63 = vld [vmem:[#allocation26_spill] sm:$0xff]  ;;  %v1368_v5 = vadd.f32 %v5375_v26, %v5374_v51  ;;  %v5376_v42 = vld [vmem:[#allocation17_spill] sm:$0xff]  ;;  %v5377_v40 = vld [vmem:[#allocation31_spill] sm:$0xff] }
 0x41a   : > { %v1933_v48 = vadd.f32 %v1841_v11, %v1645_v44 }
 0x41b   : > { %v1835_v21 = vpop.permute.xlu0 %1834  ;;  %v1647_v44 = vadd.f32 %v1615_v49, %v1359_v61  ;;  %v1369_v61 = vadd.f32 %v5377_v40, %v5376_v42  ;;  %v5379_v40 = vld [vmem:[#allocation18_spill] sm:$0xff] }
 0x41c   : > { %v1965_v8 = vpack.c.bf16 %v1933_v48, %v1932_v0  ;;  %v1930_v47 = vadd.f32 %v1835_v21, %v1642_v57  ;;  %v1364_v0 = vadd.f32 %v5363_v25, %v5362_v13  ;;  %v5364_v48 = vld [vmem:[#allocation14_spill] sm:$0xff] }
 0x41d   : > { %v1837_v36 = vpop.permute.xlu1 %1836  ;;  %v1365_v21 = vadd.f32 %v5365_v63, %v5364_v48 }
 0x41e   : > { %v1931_v24 = vadd.f32 %v1837_v36, %v1643_v17  ;;  %v1652_v46 = vadd.f32 %v5366_v59, %v1364_v0  ;;  %v5367_v36 = vld [vmem:[#allocation33_spill] sm:$0xff] }
 0x41f   : > { %v1847_v10 = vpop.permute.xlu0 %1846  ;;  %v1653_v41 = vadd.f32 %v5367_v36, %v1365_v21 }
 0x420   : > { %v1964_v45 = vpack.c.bf16 %v1931_v24, %v1930_v47  ;;  %v1936_v54 = vadd.f32 %v1847_v10, %v1648_v52  ;;  %v1362_v47 = vadd.f32 %v5369_v4, %v5368_v19  ;;  %v5370_v24 = vld [vmem:[#allocation15_spill] sm:$0xff] }
 0x421   : > { %v1849_v31 = vpop.permute.xlu1 %1848  ;;  %v5371_v52 = vld [vmem:[#allocation27_spill] sm:$0xff] }
 0x422   : > { %v1937_v60 = vadd.f32 %v1849_v31, %v1649_v30  ;;  %3588 = vmatprep.mubr.msk.bf16.mxu0 %vm1991_vm2, %v1964_v45  ;;  %v1363_v10 = vadd.f32 %v5371_v52, %v5370_v24  ;;  %v1650_v49 = vadd.f32 %v5372_v16, %v1362_v47  ;;  %v5373_v45 = vld [vmem:[#allocation35_spill] sm:$0xff] }
 0x423   : > { %3589 = vmatmul.mubr.msk.bf16.vlgmr.msra.gmra.mrb[32].mxu0 %vm1991_vm2, %v1965_v8  ;;  %v1843_v1 = vpop.permute.xlu0 %1842 }
 0x424   : > { %v1967_v62 = vpack.c.bf16 %v1937_v60, %v1936_v54  ;;  %v1934_v34 = vadd.f32 %v1843_v1, %v1646_v39  ;;  %v1651_v30 = vadd.f32 %v5373_v45, %v1363_v10 }
 0x425   : > { %v1845_v11 = vpop.permute.xlu1 %1844 }
 0x426   : > { %v1935_v57 = vadd.f32 %v1845_v11, %v1647_v44  ;;  %v1656_v44 = vadd.f32 %v4851_v12, %v1368_v5 }
 0x427   : > { %v1855_v17 = vpop.permute.xlu0 %1854 }
 0x428   : > { %v1966_v29 = vpack.c.bf16 %v1935_v57, %v1934_v34  ;;  %v1940_v2 = vadd.f32 %v1855_v17, %v1652_v46  ;;  %v5378_v34 = vld [vmem:[#allocation38_spill] sm:$0xff] }
 0x429   : > { %v1857_v8 = vpop.permute.xlu1 %1856 }
 0x42a   : > { %v1941_v9 = vadd.f32 %v1857_v8, %v1653_v41  ;;  %3592 = vmatprep.mubr.msk.bf16.mxu0 %vm1991_vm2, %v1966_v29 }
 0x42b   : > { %3593 = vmatmul.mubr.msk.bf16.gmra.mrb[36].mxu0 %vm1991_vm2, %v1967_v62  ;;  %v1851_v35 = vpop.permute.xlu0 %1850  ;;  %v1657_v62 = vadd.f32 %v4855_v32, %v1369_v61 }
 0x42c   : > { %v1969_v37 = vpack.c.bf16 %v1941_v9, %v1940_v2  ;;  %v1938_v54 = vadd.f32 %v1851_v35, %v1650_v49 }
 0x42d   : > { %v1853_v31 = vpop.permute.xlu1 %1852 }
 0x42e   : > { %v1939_v60 = vadd.f32 %v1853_v31, %v1651_v30  ;;  %v3782_v30 = vld [vmem:[#allocation2 + $0xb0] sm:$0xff]  }
 0x42f   : > { %v1863_v1 = vpop.permute.xlu0 %1862 }
 0x430   : > { %v1968_v39 = vpack.c.bf16 %v1939_v60, %v1938_v54  ;;  %v1944_v13 = vadd.f32 %v1863_v1, %v1656_v44 }
 0x431   : > { %v1865_v11 = vpop.permute.xlu1 %1864 }
 0x432   : > { %v1945_v25 = vadd.f32 %v1865_v11, %v1657_v62  ;;  %3596 = vmatprep.mubr.msk.bf16.mxu0 %vm1991_vm2, %v1968_v39 }
 0x433   : > { %3597 = vmatmul.mubr.msk.bf16.gmra.mrb[40].mxu0 %vm1991_vm2, %v1969_v37  ;;  %v1859_v0 = vpop.permute.xlu0 %1858 }
 0x434   : > { %v1971_v48 = vpack.c.bf16 %v1945_v25, %v1944_v13  ;;  %v1942_v21 = vadd.f32 %v1859_v0, %v4867_v38  ;;  %v3784_v25 = vld [vmem:[#allocation2 + $0xc0] sm:$0xff]  }
 0x435   : > { %v1861_v63 = vpop.permute.xlu1 %1860 }
 0x436   : > { %v1943_v57 = vadd.f32 %v1861_v63, %v5378_v34 }
 0x438   : > { %v1970_v17 = vpack.c.bf16 %v1943_v57, %v1942_v21 }
 0x43a   : > { %3600 = vmatprep.mubr.msk.bf16.mxu0 %vm1991_vm2, %v1970_v17 }
 0x43b   : > { %3601 = vmatmul.mubr.msk.bf16.gmra.mrb[44].mxu0 %vm1991_vm2, %v1971_v48 }
 0x440   : > { %v1871_v12 = vpop.permute.xlu0 %1870 }
 0x441   : > { %v1948_v29 = vadd.f32 %v1871_v12, %v4882_v50 }
 0x442   : > { %v1873_v32 = vpop.permute.xlu1 %1872 }
 0x443   : > { %v1949_v59 = vadd.f32 %v1873_v32, %v4885_v6 }
 0x445   : > { %v1973_v46 = vpack.c.bf16 %v1949_v59, %v1948_v29 }
 0x448   : > { %v1867_v36 = vpop.permute.xlu0 %1866 }
 0x449   : > { %v1946_v8 = vadd.f32 %v1867_v36, %v4893_v20 }
 0x44a   : > { %v1869_v41 = vpop.permute.xlu1 %1868 }
 0x44b   : > { %v1947_v38 = vadd.f32 %v1869_v41, %v4895_v56 }
 0x44d   : > { %v1972_v19 = vpack.c.bf16 %v1947_v38, %v1946_v8 }
 0x44f   : > { %3604 = vmatprep.mubr.msk.bf16.mxu0 %vm1991_vm2, %v1972_v19 }
 0x450   : > { %3605 = vmatmul.mubr.msk.bf16.gmra.mrb[48].mxu0 %vm1991_vm2, %v1973_v46 }
 0x458   : > { %v1879_v4 = vpop.permute.xlu0 %1878 }
 0x459   : > { %v1952_v24 = vadd.f32 %v1879_v4, %v4906_v3 }
 0x45a   : > { %v1881_v47 = vpop.permute.xlu1 %1880 }
 0x45b   : > { %v1953_v50 = vadd.f32 %v1881_v47, %v4909_v28  ;;  %v3781_v28 = vld [vmem:[#allocation2 + $0xa8] sm:$0xff]  }
 0x45c   : > { %3624 = vmatprep.subr.bf16.mxu1 %v3781_v28 }
 0x45d   : > { %v1975_v52 = vpack.c.bf16 %v1953_v50, %v1952_v24  ;;  %3625 = vmatpush3.bf16.msra.mxu1 %v3781_v28 }
 0x45e   : > { %3626 = vmatprep.subr.bf16.mxu1 %v3782_v30 }
 0x460   : > { %v1875_v6 = vpop.permute.xlu0 %1874 }
 0x461   : > { %v1950_v2 = vadd.f32 %v1875_v6, %v4916_v53  ;;  %3627 = vmatpush3.bf16.msra.mxu1 %v3782_v30 }
 0x462   : > { %v1877_v10 = vpop.permute.xlu1 %1876 }
 0x463   : > { %v1951_v20 = vadd.f32 %v1877_v10, %v4920_v18 }
 0x465   : > { %v1974_v9 = vpack.c.bf16 %v1951_v20, %v1950_v2 }
 0x467   : > { %3608 = vmatprep.mubr.msk.bf16.mxu0 %vm1991_vm2, %v1974_v9 }
 0x468   : > { %3609 = vmatmul.mubr.msk.bf16.gmra.mrb[52].mxu0 %vm1991_vm2, %v1975_v52 }
 0x470   : > { %v1887_v56 = vpop.permute.xlu0 %1886 }
 0x471   : > { %v1956_v37 = vadd.f32 %v1887_v56, %v4931_v55 }
 0x472   : > { %v1889_v35 = vpop.permute.xlu1 %1888 }
 0x473   : > { %v1957_v3 = vadd.f32 %v1889_v35, %v4934_v15 }
 0x475   : > { %v1977_v16 = vpack.c.bf16 %v1957_v3, %v1956_v37 }
 0x478   : > { %v1883_v49 = vpop.permute.xlu0 %1882 }
 0x479   : > { %v1954_v53 = vadd.f32 %v1883_v49, %v4943_v23  ;;  %v1384_v23 = vadd.f32 %v4918_v33, %v5379_v40  ;;  %v3783_v33 = vld [vmem:[#allocation2 + $0xb8] sm:$0xff]  }
 0x47a   : > { %v1885_v45 = vpop.permute.xlu1 %1884  ;;  %3660 = vmatprep.subr.bf16.mxu0 %v3783_v33 }
 0x47b   : > { %v1955_v18 = vadd.f32 %v1885_v45, %v4947_v58  ;;  %v5380_v58 = vld [vmem:[#allocation19_spill] sm:$0xff]  ;;  %3661 = vmatpush3.bf16.msra.mxu0 %v3783_v33 }
 0x47c   : > { %v1575_v51 = vpop.permute.xlu0 %1574  ;;  %v1385_v61 = vadd.f32 %v4922_v27, %v5380_v58  ;;  %3662 = vmatprep.subr.bf16.mxu0 %v3784_v25  ;;  %v3785_v27 = vld [vmem:[#allocation2 + $0xc8] sm:$0xff]  }
 0x47d   : > { %v1976_v31 = vpack.c.bf16 %v1955_v18, %v1954_v53  ;;  %v1640_v26 = vmul.f32 %v1575_v51, %v4952_v7 }
 0x47e   : > { %v1577_v55 = vpop.permute.xlu1 %1576 }
 0x47f   : > { %3612 = vmatprep.mubr.msk.bf16.mxu0 %vm1991_vm2, %v1976_v31  ;;  %v1641_v5 = vmul.f32 %v1577_v55, %v4958_v43  ;;  %v1672_v44 = vadd.f32 %v1640_v26, %v1384_v23  ;;  %3663 = vmatpush3.bf16.msra.mxu0 %v3784_v25 }
 0x480   : > { %3613 = vmatmul.mubr.msk.bf16.gmra.mrb[56].mxu0 %vm1991_vm2, %v1977_v16  ;;  %3664 = vmatprep.subr.bf16.mxu0 %v3785_v27 }
 0x481   : > { %v1673_v62 = vadd.f32 %v1641_v5, %v1385_v61 }
 0x483   : > { %3665 = vmatpush3.bf16.msra.mxu0 %v3785_v27 }
 0x484   : > { %v1891_v15 = vpop.permute.xlu0 %1890 }
 0x485   : > { %v1958_v54 = vadd.f32 %v1891_v15, %v4972_v14  ;;  %v5060_v14 = vld [vmem:[%s5292_s3 + $0x3] ss:$0 sm:$0xff] }
 0x486   : > { %v1893_v42 = vpop.permute.xlu1 %1892 }
 0x487   : > { %v1959_v60 = vadd.f32 %v1893_v42, %v4979_v22  ;;  %v3786_v22 = vld [vmem:[#allocation2 + $0xd0] sm:$0xff]  }
 0x488   : > { %v1895_v1 = vpop.permute.xlu0 %1894  ;;  %3666 = vmatprep.subr.bf16.mxu0 %v3786_v22 }
 0x489   : > { %v1978_v39 = vpack.c.bf16 %v1959_v60, %v1958_v54  ;;  %v1960_v13 = vadd.f32 %v1895_v1, %v1672_v44  ;;  %3667 = vmatpush3.bf16.msra.mxu0 %v3786_v22 }
 0x48a   : > { %v1897_v11 = vpop.permute.xlu1 %1896 }
 0x48b   : > { %v1961_v7 = vadd.f32 %v1897_v11, %v1673_v62  ;;  %3616 = vmatprep.mubr.msk.bf16.mxu0 %vm1991_vm2, %v1978_v39 }
 0x48d   : > { %v1979_v43 = vpack.c.bf16 %v1961_v7, %v1960_v13 }
 0x48f   : > { %3617 = vmatmul.mubr.msk.bf16.gmra.mrb[60].mxu0 %vm1991_vm2, %v1979_v43 }
 0x4f6   : > { %v3590_v0 = vpop.f32.mrb[32].mxu0 }
 0x4f7   : > { %v2083_v48 = vadd.f32 %v3590_v0, %v5060_v14  ;;  %v2074_v63 = vpop.f32.mrb[33].mxu0 }
 0x4f8   : > { %v2075_v21 = vadd.f32 %v5060_v14, %v2074_v63  ;;  %v3591_v34 = vpop.f32.mrb[34].mxu0 }
 0x4f9   : > { %v2086_v57 = vadd.f32 %v3591_v34, %v5060_v14  ;;  %v2077_v17 = vpop.f32.mrb[35].mxu0  ;;  %v2203_v32 = vmax.f32 %v2083_v48, 0.0 }
 0x4fa   : > { %v2078_v12 = vadd.f32 %v5060_v14, %v2077_v17  ;;  %v2201_v59 = vmax.f32 %v2075_v21, 0.0 }
 0x4fb   : > { %v2204_v29 = vmax.f32 %v2086_v57, 0.0 }
 0x4fc   : > { %v2202_v46 = vmax.f32 %v2078_v12, 0.0 }
 0x4fd   : > { %v2242_v36 = vpack.c.bf16 %v2204_v29, %v2203_v32 }
 0x4fe   : > { %v2241_v41 = vpack.c.bf16 %v2202_v46, %v2201_v59  ;;  %v3594_v8 = vpop.f32.mrb[36].mxu0 }
 0x4ff   : > { %v2099_v38 = vadd.f32 %v3594_v8, %v5060_v14  ;;  %v2090_v19 = vpop.f32.mrb[37].mxu0 }
 0x500   : > { %v2091_v4 = vadd.f32 %v5060_v14, %v2090_v19  ;;  %v3595_v47 = vpop.f32.mrb[38].mxu0  ;;  %3628 = vmatprep.mubr.msk.bf16.mxu1 %vm952_vm1, %v2241_v41 }
 0x501   : > { %v2102_v24 = vadd.f32 %v3595_v47, %v5060_v14  ;;  %v2093_v50 = vpop.f32.mrb[39].mxu0  ;;  %3629 = vmatmul.mubr.msk.bf16.vlgmr.msra.gmra.mrb[64].mxu1 %vm952_vm1, %v2242_v36  ;;  %v2207_v6 = vmax.f32 %v2099_v38, 0.0 }
 0x502   : > { %v2094_v52 = vadd.f32 %v5060_v14, %v2093_v50  ;;  %v2205_v2 = vmax.f32 %v2091_v4, 0.0 }
 0x503   : > { %v2208_v10 = vmax.f32 %v2102_v24, 0.0 }
 0x504   : > { %v2206_v20 = vmax.f32 %v2094_v52, 0.0 }
 0x505   : > { %v2244_v9 = vpack.c.bf16 %v2208_v10, %v2207_v6 }
 0x506   : > { %v2243_v56 = vpack.c.bf16 %v2206_v20, %v2205_v2  ;;  %v3598_v35 = vpop.f32.mrb[40].mxu0 }
 0x507   : > { %v2115_v37 = vadd.f32 %v3598_v35, %v5060_v14  ;;  %v2106_v3 = vpop.f32.mrb[41].mxu0 }
 0x508   : > { %v2107_v16 = vadd.f32 %v5060_v14, %v2106_v3  ;;  %v3599_v28 = vpop.f32.mrb[42].mxu0  ;;  %3632 = vmatprep.mubr.msk.bf16.mxu1 %vm952_vm1, %v2243_v56 }
 0x509   : > { %v2118_v49 = vadd.f32 %v3599_v28, %v5060_v14  ;;  %v2109_v45 = vpop.f32.mrb[43].mxu0  ;;  %3633 = vmatmul.mubr.msk.bf16.gmra.mrb[68].mxu1 %vm952_vm1, %v2244_v9  ;;  %v2211_v18 = vmax.f32 %v2115_v37, 0.0  ;;  %v3787_v9 = vld [vmem:[#allocation2 + $0xd8] sm:$0xff]  }
 0x50a   : > { %v2110_v53 = vadd.f32 %v5060_v14, %v2109_v45  ;;  %v2209_v31 = vmax.f32 %v2107_v16, 0.0  ;;  %3668 = vmatprep.subr.bf16.mxu0 %v3787_v9  ;;  %v3788_v45 = vld [vmem:[#allocation2 + $0xe0] sm:$0xff]  }
 0x50b   : > { %v2212_v30 = vmax.f32 %v2118_v49, 0.0  ;;  %3669 = vmatpush3.bf16.msra.mxu0 %v3787_v9 }
 0x50c   : > { %v2210_v51 = vmax.f32 %v2110_v53, 0.0  ;;  %3670 = vmatprep.subr.bf16.mxu0 %v3788_v45 }
 0x50d   : > { %v2246_v55 = vpack.c.bf16 %v2212_v30, %v2211_v18 }
 0x50e   : > { %v2245_v15 = vpack.c.bf16 %v2210_v51, %v2209_v31  ;;  %v3602_v26 = vpop.f32.mrb[44].mxu0 }
 0x50f   : > { %v2131_v5 = vadd.f32 %v3602_v26, %v5060_v14  ;;  %v2122_v42 = vpop.f32.mrb[45].mxu0  ;;  %3671 = vmatpush3.bf16.msra.mxu0 %v3788_v45 }
 0x510   : > { %v2123_v40 = vadd.f32 %v5060_v14, %v2122_v42  ;;  %v3603_v23 = vpop.f32.mrb[46].mxu0  ;;  %3636 = vmatprep.mubr.msk.bf16.mxu1 %vm952_vm1, %v2245_v15 }
 0x511   : > { %v2134_v58 = vadd.f32 %v3603_v23, %v5060_v14  ;;  %v2125_v61 = vpop.f32.mrb[47].mxu0  ;;  %3637 = vmatmul.mubr.msk.bf16.gmra.mrb[72].mxu1 %vm952_vm1, %v2246_v55  ;;  %v2215_v60 = vmax.f32 %v2131_v5, 0.0 }
 0x512   : > { %v2126_v54 = vadd.f32 %v5060_v14, %v2125_v61  ;;  %v2213_v39 = vmax.f32 %v2123_v40, 0.0 }
 0x513   : > { %v2216_v1 = vmax.f32 %v2134_v58, 0.0 }
 0x514   : > { %v2214_v44 = vmax.f32 %v2126_v54, 0.0 }
 0x515   : > { %v2248_v62 = vpack.c.bf16 %v2216_v1, %v2215_v60  ;;  %v5113_v1 = vld [vmem:[%s5292_s3 + $0x4] ss:$0 sm:$0xff] }
 0x516   : > { %v2247_v11 = vpack.c.bf16 %v2214_v44, %v2213_v39 }
 0x518   : > { %3640 = vmatprep.mubr.msk.bf16.mxu1 %vm952_vm1, %v2247_v11 }
 0x519   : > { %3641 = vmatmul.mubr.msk.bf16.gmra.mrb[76].mxu1 %vm952_vm1, %v2248_v62 }
 0x523   : > { %v3606_v13 = vpop.f32.mrb[48].mxu0 }
 0x524   : > { %v2147_v7 = vadd.f32 %v3606_v13, %v5060_v14  ;;  %v2138_v43 = vpop.f32.mrb[49].mxu0 }
 0x525   : > { %v2139_v33 = vadd.f32 %v5060_v14, %v2138_v43  ;;  %v3607_v25 = vpop.f32.mrb[50].mxu0 }
 0x526   : > { %v2150_v27 = vadd.f32 %v3607_v25, %v5060_v14  ;;  %v2141_v22 = vpop.f32.mrb[51].mxu0  ;;  %v2219_v48 = vmax.f32 %v2147_v7, 0.0 }
 0x527   : > { %v2142_v0 = vadd.f32 %v5060_v14, %v2141_v22  ;;  %v2217_v21 = vmax.f32 %v2139_v33, 0.0 }
 0x528   : > { %v2220_v63 = vmax.f32 %v2150_v27, 0.0 }
 0x529   : > { %v2218_v34 = vmax.f32 %v2142_v0, 0.0 }
 0x52a   : > { %v2250_v57 = vpack.c.bf16 %v2220_v63, %v2219_v48 }
 0x52b   : > { %v2249_v17 = vpack.c.bf16 %v2218_v34, %v2217_v21 }
 0x52d   : > { %3644 = vmatprep.mubr.msk.bf16.mxu1 %vm952_vm1, %v2249_v17 }
 0x52e   : > { %3645 = vmatmul.mubr.msk.bf16.gmra.mrb[80].mxu1 %vm952_vm1, %v2250_v57 }
 0x53b   : > { %v3610_v12 = vpop.f32.mrb[52].mxu0 }
 0x53c   : > { %v2163_v32 = vadd.f32 %v3610_v12, %v5060_v14  ;;  %v2154_v29 = vpop.f32.mrb[53].mxu0 }
 0x53d   : > { %v2155_v59 = vadd.f32 %v5060_v14, %v2154_v29  ;;  %v3611_v46 = vpop.f32.mrb[54].mxu0 }
 0x53e   : > { %v2166_v36 = vadd.f32 %v3611_v46, %v5060_v14  ;;  %v2157_v41 = vpop.f32.mrb[55].mxu0  ;;  %v2223_v38 = vmax.f32 %v2163_v32, 0.0 }
 0x53f   : > { %v2158_v8 = vadd.f32 %v5060_v14, %v2157_v41  ;;  %v2221_v4 = vmax.f32 %v2155_v59, 0.0 }
 0x540   : > { %v2224_v19 = vmax.f32 %v2166_v36, 0.0 }
 0x541   : > { %v2222_v47 = vmax.f32 %v2158_v8, 0.0 }
 0x542   : > { %v2252_v24 = vpack.c.bf16 %v2224_v19, %v2223_v38 }
 0x543   : > { %v2251_v50 = vpack.c.bf16 %v2222_v47, %v2221_v4 }
 0x545   : > { %3648 = vmatprep.mubr.msk.bf16.mxu1 %vm952_vm1, %v2251_v50 }
 0x546   : > { %3649 = vmatmul.mubr.msk.bf16.gmra.mrb[84].mxu1 %vm952_vm1, %v2252_v24 }
 0x553   : > { %v3614_v52 = vpop.f32.mrb[56].mxu0 }
 0x554   : > { %v2179_v6 = vadd.f32 %v3614_v52, %v5060_v14  ;;  %v2170_v10 = vpop.f32.mrb[57].mxu0 }
 0x555   : > { %v2171_v2 = vadd.f32 %v5060_v14, %v2170_v10  ;;  %v3615_v20 = vpop.f32.mrb[58].mxu0 }
 0x556   : > { %v2182_v56 = vadd.f32 %v3615_v20, %v5060_v14  ;;  %v2173_v35 = vpop.f32.mrb[59].mxu0  ;;  %v2227_v3 = vmax.f32 %v2179_v6, 0.0 }
 0x557   : > { %v2174_v37 = vadd.f32 %v5060_v14, %v2173_v35  ;;  %v2225_v28 = vmax.f32 %v2171_v2, 0.0 }
 0x558   : > { %v2228_v16 = vmax.f32 %v2182_v56, 0.0 }
 0x559   : > { %v2226_v49 = vmax.f32 %v2174_v37, 0.0 }
 0x55a   : > { %v2254_v53 = vpack.c.bf16 %v2228_v16, %v2227_v3 }
 0x55b   : > { %v2253_v18 = vpack.c.bf16 %v2226_v49, %v2225_v28 }
 0x55d   : > { %3652 = vmatprep.mubr.msk.bf16.mxu1 %vm952_vm1, %v2253_v18 }
 0x55e   : > { %3653 = vmatmul.mubr.msk.bf16.gmra.mrb[88].mxu1 %vm952_vm1, %v2254_v53 }
 0x562   : > { %v3618_v30 = vpop.f32.mrb[60].mxu0 }
 0x563   : > { %v2195_v31 = vadd.f32 %v3618_v30, %v5060_v14  ;;  %v2186_v51 = vpop.f32.mrb[61].mxu0 }
 0x564   : > { %v2187_v55 = vadd.f32 %v5060_v14, %v2186_v51  ;;  %v3619_v15 = vpop.f32.mrb[62].mxu0 }
 0x565   : > { %v2198_v26 = vadd.f32 %v3619_v15, %v5060_v14  ;;  %v2189_v5 = vpop.f32.mrb[63].mxu0  ;;  %v2231_v40 = vmax.f32 %v2195_v31, 0.0 }
 0x566   : > { %v2190_v42 = vadd.f32 %v5060_v14, %v2189_v5  ;;  %v2229_v58 = vmax.f32 %v2187_v55, 0.0 }
 0x567   : > { %v2232_v23 = vmax.f32 %v2198_v26, 0.0 }
 0x568   : > { %v2230_v61 = vmax.f32 %v2190_v42, 0.0 }
 0x569   : > { %v2256_v54 = vpack.c.bf16 %v2232_v23, %v2231_v40 }
 0x56a   : > { %v2255_v60 = vpack.c.bf16 %v2230_v61, %v2229_v58 }
 0x56c   : > { %3656 = vmatprep.mubr.msk.bf16.mxu1 %vm952_vm1, %v2255_v60 }
 0x56d   : > { %3657 = vmatmul.mubr.msk.bf16.gmra.mrb[92].mxu1 %vm952_vm1, %v2256_v54 }
 0x5d4   : > { %v3630_v39 = vpop.f32.mrb[64].mxu1 }
 0x5d5   : > { %v2377_v44 = vadd.f32 %v3630_v39, %v5113_v1  ;;  %v2368_v62 = vpop.f32.mrb[65].mxu1 }
 0x5d6   : > { %v2369_v14 = vadd.f32 %v5113_v1, %v2368_v62  ;;  %v3631_v11 = vpop.f32.mrb[66].mxu1 }
 0x5d7   : > { %v2380_v13 = vadd.f32 %v3631_v11, %v5113_v1  ;;  %v2371_v7 = vpop.f32.mrb[67].mxu1  ;;  %v2497_v33 = vmax.f32 %v2377_v44, 0.0 }
 0x5d8   : > { %v2372_v43 = vadd.f32 %v5113_v1, %v2371_v7  ;;  %v2495_v27 = vmax.f32 %v2369_v14, 0.0 }
 0x5d9   : > { %v2498_v25 = vmax.f32 %v2380_v13, 0.0 }
 0x5da   : > { %v2496_v22 = vmax.f32 %v2372_v43, 0.0 }
 0x5db   : > { %v2540_v0 = vpack.c.bf16 %v2498_v25, %v2497_v33 }
 0x5dc   : > { %v2539_v48 = vpack.c.bf16 %v2496_v22, %v2495_v27  ;;  %v3634_v63 = vpop.f32.mrb[68].mxu1 }
 0x5dd   : > { %v2393_v21 = vadd.f32 %v3634_v63, %v5113_v1  ;;  %v2384_v34 = vpop.f32.mrb[69].mxu1 }
 0x5de   : > { %v2385_v57 = vadd.f32 %v5113_v1, %v2384_v34  ;;  %v3635_v17 = vpop.f32.mrb[70].mxu1  ;;  %3672 = vmatprep.mubr.msk.bf16.mxu0 %vm657_vm0, %v2539_v48 }
 0x5df   : > { %v2396_v12 = vadd.f32 %v3635_v17, %v5113_v1  ;;  %v2387_v32 = vpop.f32.mrb[71].mxu1  ;;  %3673 = vmatmul.mubr.msk.bf16.vlgmr.msra.gmra.mrb[64].mxu0 %vm657_vm0, %v2540_v0  ;;  %v2501_v59 = vmax.f32 %v2393_v21, 0.0 }
 0x5e0   : > { %v2388_v29 = vadd.f32 %v5113_v1, %v2387_v32  ;;  %v2499_v36 = vmax.f32 %v2385_v57, 0.0 }
 0x5e1   : > { %v2502_v46 = vmax.f32 %v2396_v12, 0.0 }
 0x5e2   : > { %v2500_v41 = vmax.f32 %v2388_v29, 0.0 }
 0x5e3   : > { %v2542_v8 = vpack.c.bf16 %v2502_v46, %v2501_v59 }
 0x5e4   : > { %v2541_v38 = vpack.c.bf16 %v2500_v41, %v2499_v36  ;;  %v3638_v19 = vpop.f32.mrb[72].mxu1 }
 0x5e5   : > { %v2409_v4 = vadd.f32 %v3638_v19, %v5113_v1  ;;  %v2400_v47 = vpop.f32.mrb[73].mxu1 }
 0x5e6   : > { %v2401_v24 = vadd.f32 %v5113_v1, %v2400_v47  ;;  %v3639_v50 = vpop.f32.mrb[74].mxu1  ;;  %3676 = vmatprep.mubr.msk.bf16.mxu0 %vm657_vm0, %v2541_v38 }
 0x5e7   : > { %v2412_v52 = vadd.f32 %v3639_v50, %v5113_v1  ;;  %v2403_v6 = vpop.f32.mrb[75].mxu1  ;;  %3677 = vmatmul.mubr.msk.bf16.gmra.mrb[68].mxu0 %vm657_vm0, %v2542_v8  ;;  %v2505_v2 = vmax.f32 %v2409_v4, 0.0 }
 0x5e8   : > { %v2404_v10 = vadd.f32 %v5113_v1, %v2403_v6  ;;  %v2503_v9 = vmax.f32 %v2401_v24, 0.0 }
 0x5e9   : > { %v2506_v20 = vmax.f32 %v2412_v52, 0.0 }
 0x5ea   : > { %v2504_v56 = vmax.f32 %v2404_v10, 0.0 }
 0x5eb   : > { %v2544_v35 = vpack.c.bf16 %v2506_v20, %v2505_v2 }
 0x5ec   : > { %v2543_v37 = vpack.c.bf16 %v2504_v56, %v2503_v9  ;;  %v3642_v3 = vpop.f32.mrb[76].mxu1 }
 0x5ed   : > { %v2425_v16 = vadd.f32 %v3642_v3, %v5113_v1  ;;  %v2416_v28 = vpop.f32.mrb[77].mxu1 }
 0x5ee   : > { %v2417_v49 = vadd.f32 %v5113_v1, %v2416_v28  ;;  %v3643_v45 = vpop.f32.mrb[78].mxu1  ;;  %3680 = vmatprep.mubr.msk.bf16.mxu0 %vm657_vm0, %v2543_v37 }
 0x5ef   : > { %v2428_v53 = vadd.f32 %v3643_v45, %v5113_v1  ;;  %v2419_v18 = vpop.f32.mrb[79].mxu1  ;;  %3681 = vmatmul.mubr.msk.bf16.gmra.mrb[72].mxu0 %vm657_vm0, %v2544_v35  ;;  %v2509_v31 = vmax.f32 %v2425_v16, 0.0 }
 0x5f0   : > { %v2420_v30 = vadd.f32 %v5113_v1, %v2419_v18  ;;  %v2507_v55 = vmax.f32 %v2417_v49, 0.0 }
 0x5f1   : > { %v2510_v51 = vmax.f32 %v2428_v53, 0.0 }
 0x5f2   : > { %v2508_v15 = vmax.f32 %v2420_v30, 0.0  ;;  %v5166_v30 = vld [vmem:[%s5292_s3 + $0x5] ss:$0 sm:$0xff] }
 0x5f3   : > { %v2546_v26 = vpack.c.bf16 %v2510_v51, %v2509_v31 }
 0x5f4   : > { %v2545_v5 = vpack.c.bf16 %v2508_v15, %v2507_v55 }
 0x5f6   : > { %3684 = vmatprep.mubr.msk.bf16.mxu0 %vm657_vm0, %v2545_v5 }
 0x5f7   : > { %3685 = vmatmul.mubr.msk.bf16.gmra.mrb[76].mxu0 %vm657_vm0, %v2546_v26 }
 0x601   : > { %v3646_v42 = vpop.f32.mrb[80].mxu1 }
 0x602   : > { %v2441_v40 = vadd.f32 %v3646_v42, %v5113_v1  ;;  %v2432_v23 = vpop.f32.mrb[81].mxu1 }
 0x603   : > { %v2433_v58 = vadd.f32 %v5113_v1, %v2432_v23  ;;  %v3647_v61 = vpop.f32.mrb[82].mxu1 }
 0x604   : > { %v2444_v54 = vadd.f32 %v3647_v61, %v5113_v1  ;;  %v2435_v60 = vpop.f32.mrb[83].mxu1  ;;  %v2513_v44 = vmax.f32 %v2441_v40, 0.0 }
 0x605   : > { %v2436_v39 = vadd.f32 %v5113_v1, %v2435_v60  ;;  %v2511_v14 = vmax.f32 %v2433_v58, 0.0 }
 0x606   : > { %v2514_v62 = vmax.f32 %v2444_v54, 0.0 }
 0x607   : > { %v2512_v11 = vmax.f32 %v2436_v39, 0.0 }
 0x608   : > { %v2548_v13 = vpack.c.bf16 %v2514_v62, %v2513_v44 }
 0x609   : > { %v2547_v7 = vpack.c.bf16 %v2512_v11, %v2511_v14 }
 0x60b   : > { %3688 = vmatprep.mubr.msk.bf16.mxu0 %vm657_vm0, %v2547_v7 }
 0x60c   : > { %3689 = vmatmul.mubr.msk.bf16.gmra.mrb[80].mxu0 %vm657_vm0, %v2548_v13 }
 0x619   : > { %v3650_v43 = vpop.f32.mrb[84].mxu1 }
 0x61a   : > { %v2457_v33 = vadd.f32 %v3650_v43, %v5113_v1  ;;  %v2448_v25 = vpop.f32.mrb[85].mxu1 }
 0x61b   : > { %v2449_v27 = vadd.f32 %v5113_v1, %v2448_v25  ;;  %v3651_v22 = vpop.f32.mrb[86].mxu1 }
 0x61c   : > { %v2460_v0 = vadd.f32 %v3651_v22, %v5113_v1  ;;  %v2451_v48 = vpop.f32.mrb[87].mxu1  ;;  %v2517_v21 = vmax.f32 %v2457_v33, 0.0 }
 0x61d   : > { %v2452_v63 = vadd.f32 %v5113_v1, %v2451_v48  ;;  %v2515_v57 = vmax.f32 %v2449_v27, 0.0 }
 0x61e   : > { %v2518_v34 = vmax.f32 %v2460_v0, 0.0 }
 0x61f   : > { %v2516_v17 = vmax.f32 %v2452_v63, 0.0 }
 0x620   : > { %v2550_v12 = vpack.c.bf16 %v2518_v34, %v2517_v21 }
 0x621   : > { %v2549_v32 = vpack.c.bf16 %v2516_v17, %v2515_v57 }
 0x623   : > { %3692 = vmatprep.mubr.msk.bf16.mxu0 %vm657_vm0, %v2549_v32 }
 0x624   : > { %3693 = vmatmul.mubr.msk.bf16.gmra.mrb[84].mxu0 %vm657_vm0, %v2550_v12 }
 0x631   : > { %v3654_v29 = vpop.f32.mrb[88].mxu1 }
 0x632   : > { %v2473_v59 = vadd.f32 %v3654_v29, %v5113_v1  ;;  %v2464_v46 = vpop.f32.mrb[89].mxu1 }
 0x633   : > { %v2465_v36 = vadd.f32 %v5113_v1, %v2464_v46  ;;  %v3655_v41 = vpop.f32.mrb[90].mxu1 }
 0x634   : > { %v2476_v8 = vadd.f32 %v3655_v41, %v5113_v1  ;;  %v2467_v38 = vpop.f32.mrb[91].mxu1  ;;  %v2521_v4 = vmax.f32 %v2473_v59, 0.0 }
 0x635   : > { %v2468_v19 = vadd.f32 %v5113_v1, %v2467_v38  ;;  %v2519_v24 = vmax.f32 %v2465_v36, 0.0 }
 0x636   : > { %v2522_v47 = vmax.f32 %v2476_v8, 0.0 }
 0x637   : > { %v2520_v50 = vmax.f32 %v2468_v19, 0.0 }
 0x638   : > { %v2552_v52 = vpack.c.bf16 %v2522_v47, %v2521_v4 }
 0x639   : > { %v2551_v6 = vpack.c.bf16 %v2520_v50, %v2519_v24 }
 0x63b   : > { %3696 = vmatprep.mubr.msk.bf16.mxu0 %vm657_vm0, %v2551_v6 }
 0x63c   : > { %3697 = vmatmul.mubr.msk.bf16.gmra.mrb[88].mxu0 %vm657_vm0, %v2552_v52 }
 0x640   : > { %v3658_v10 = vpop.f32.mrb[92].mxu1 }
 0x641   : > { %v2489_v2 = vadd.f32 %v3658_v10, %v5113_v1  ;;  %v2480_v20 = vpop.f32.mrb[93].mxu1 }
 0x642   : > { %v2481_v9 = vadd.f32 %v5113_v1, %v2480_v20  ;;  %v3659_v56 = vpop.f32.mrb[94].mxu1 }
 0x643   : > { %v2492_v35 = vadd.f32 %v3659_v56, %v5113_v1  ;;  %v2483_v37 = vpop.f32.mrb[95].mxu1  ;;  %v2525_v16 = vmax.f32 %v2489_v2, 0.0 }
 0x644   : > { %v2484_v3 = vadd.f32 %v5113_v1, %v2483_v37  ;;  %v2523_v49 = vmax.f32 %v2481_v9, 0.0 }
 0x645   : > { %v2526_v28 = vmax.f32 %v2492_v35, 0.0 }
 0x646   : > { %v2524_v45 = vmax.f32 %v2484_v3, 0.0 }
 0x647   : > { %v2554_v53 = vpack.c.bf16 %v2526_v28, %v2525_v16 }
 0x648   : > { %v2553_v18 = vpack.c.bf16 %v2524_v45, %v2523_v49 }
 0x64a   : > { %3700 = vmatprep.mubr.msk.bf16.mxu0 %vm657_vm0, %v2553_v18 }
 0x64b   : > { %3701 = vmatmul.mubr.msk.bf16.gmra.mrb[92].mxu0 %vm657_vm0, %v2554_v53 }
 0x6b2   : > { %v3674_v31 = vpop.f32.mrb[64].mxu0 }
 0x6b3   : > { %v2687_v51 = vadd.f32 %v3674_v31, %v5166_v30  ;;  %v2678_v55 = vpop.f32.mrb[65].mxu0 }
 0x6b4   : > { %v2679_v1 = vadd.f32 %v5166_v30, %v2678_v55  ;;  %v3675_v15 = vpop.f32.mrb[66].mxu0 }
 0x6b5   : > { %v3293_v26 = vmul.f32 -1.442695, %v2687_v51  ;;  %v2690_v5 = vadd.f32 %v3675_v15, %v5166_v30  ;;  %v2681_v42 = vpop.f32.mrb[67].mxu0 }
 0x6b6   : > { %v3291_v40 = vmul.f32 -1.442695, %v2679_v1  ;;  %v2682_v23 = vadd.f32 %v5166_v30, %v2681_v42 }
 0x6b7   : > { %3853 = vpow2.f32 %v3293_v26  ;;  %v3294_v58 = vmul.f32 -1.442695, %v2690_v5 }
 0x6b8   : > { %3855 = vpow2.f32 %v3291_v40  ;;  %v3292_v61 = vmul.f32 -1.442695, %v2682_v23 }
 0x6b9   : > { %3857 = vpow2.f32 %v3294_v58 }
 0x6ba   : > { %3859 = vpow2.f32 %v3292_v61  ;;  %v3678_v54 = vpop.f32.mrb[68].mxu0 }
 0x6bb   : > { %v2703_v60 = vadd.f32 %v3678_v54, %v5166_v30  ;;  %v2694_v39 = vpop.f32.mrb[69].mxu0 }
 0x6bc   : > { %v2695_v44 = vadd.f32 %v5166_v30, %v2694_v39  ;;  %v3679_v62 = vpop.f32.mrb[70].mxu0 }
 0x6bd   : > { %v3297_v14 = vmul.f32 -1.442695, %v2703_v60  ;;  %v2706_v11 = vadd.f32 %v3679_v62, %v5166_v30  ;;  %v2697_v13 = vpop.f32.mrb[71].mxu0 }
 0x6be   : > { %v3295_v7 = vmul.f32 -1.442695, %v2695_v44  ;;  %v2698_v43 = vadd.f32 %v5166_v30, %v2697_v13 }
 0x6bf   : > { %3861 = vpow2.f32 %v3297_v14  ;;  %v3298_v33 = vmul.f32 -1.442695, %v2706_v11 }
 0x6c0   : > { %3863 = vpow2.f32 %v3295_v7  ;;  %v3296_v25 = vmul.f32 -1.442695, %v2698_v43 }
 0x6c1   : > { %v3854_v27 = vpop.eup %3853  ;;  %3865 = vpow2.f32 %v3298_v33 }
 0x6c2   : > { %v3856_v22 = vpop.eup %3855  ;;  %v2903_v0 = vadd.f32 1.0, %v3854_v27  ;;  %3867 = vpow2.f32 %v3296_v25  ;;  %v3682_v48 = vpop.f32.mrb[72].mxu0 }
 0x6c3   : > { %v3858_v63 = vpop.eup %3857  ;;  %v2901_v21 = vadd.f32 1.0, %v3856_v22  ;;  %v2719_v34 = vadd.f32 %v3682_v48, %v5166_v30  ;;  %v2710_v57 = vpop.f32.mrb[73].mxu0 }
 0x6c4   : > { %v3860_v17 = vpop.eup %3859  ;;  %3869 = vrcp.f32 %v2903_v0  ;;  %v2904_v12 = vadd.f32 1.0, %v3858_v63  ;;  %v2711_v32 = vadd.f32 %v5166_v30, %v2710_v57  ;;  %v3683_v29 = vpop.f32.mrb[74].mxu0 }
 0x6c5   : > { %3871 = vrcp.f32 %v2901_v21  ;;  %v2902_v59 = vadd.f32 1.0, %v3860_v17  ;;  %v3301_v46 = vmul.f32 -1.442695, %v2719_v34  ;;  %v2722_v36 = vadd.f32 %v3683_v29, %v5166_v30  ;;  %v2713_v41 = vpop.f32.mrb[75].mxu0 }
 0x6c6   : > { %3873 = vrcp.f32 %v2904_v12  ;;  %v3299_v8 = vmul.f32 -1.442695, %v2711_v32  ;;  %v2714_v38 = vadd.f32 %v5166_v30, %v2713_v41 }
 0x6c7   : > { %3875 = vrcp.f32 %v2902_v59  ;;  %v3302_v19 = vmul.f32 -1.442695, %v2722_v36 }
 0x6c8   : > { %3877 = vpow2.f32 %v3301_v46  ;;  %v3300_v4 = vmul.f32 -1.442695, %v2714_v38 }
 0x6c9   : > { %v3862_v47 = vpop.eup %3861  ;;  %3879 = vpow2.f32 %v3299_v8 }
 0x6ca   : > { %v3864_v24 = vpop.eup %3863  ;;  %v2907_v50 = vadd.f32 1.0, %v3862_v47  ;;  %3881 = vpow2.f32 %v3302_v19  ;;  %v3686_v52 = vpop.f32.mrb[76].mxu0 }
 0x6cb   : > { %v3866_v6 = vpop.eup %3865  ;;  %v2905_v10 = vadd.f32 1.0, %v3864_v24  ;;  %3883 = vpow2.f32 %v3300_v4  ;;  %v2735_v2 = vadd.f32 %v3686_v52, %v5166_v30  ;;  %v2726_v20 = vpop.f32.mrb[77].mxu0 }
 0x6cc   : > { %v3868_v9 = vpop.eup %3867  ;;  %3885 = vrcp.f32 %v2907_v50  ;;  %v2908_v56 = vadd.f32 1.0, %v3866_v6  ;;  %v2727_v35 = vadd.f32 %v5166_v30, %v2726_v20  ;;  %v3687_v37 = vpop.f32.mrb[78].mxu0 }
 0x6cd   : > { %3887 = vrcp.f32 %v2905_v10  ;;  %v2906_v3 = vadd.f32 1.0, %v3868_v9  ;;  %v3305_v16 = vmul.f32 -1.442695, %v2735_v2  ;;  %v2738_v28 = vadd.f32 %v3687_v37, %v5166_v30  ;;  %v2729_v49 = vpop.f32.mrb[79].mxu0 }
 0x6ce   : > { %v3870_v45 = vpop.eup %3869  ;;  %3889 = vrcp.f32 %v2908_v56  ;;  %v3303_v53 = vmul.f32 -1.442695, %v2727_v35  ;;  %v2730_v18 = vadd.f32 %v5166_v30, %v2729_v49 }
 0x6cf   : > { %v3872_v31 = vpop.eup %3871  ;;  %2999 = vst [vmem:[%s5187_s16 + $0x10] sm:$0xff] %v3870_v45  ;;  %3891 = vrcp.f32 %v2906_v3  ;;  %v3306_v51 = vmul.f32 -1.442695, %v2738_v28 }
 0x6d0   : > { %v3874_v55 = vpop.eup %3873  ;;  %2997 = vst [vmem:[%s5187_s16] sm:$0xff] %v3872_v31  ;;  %3893 = vpow2.f32 %v3305_v16  ;;  %v3304_v1 = vmul.f32 -1.442695, %v2730_v18 }
 0x6d1   : > { %v3876_v15 = vpop.eup %3875  ;;  %3000 = vst [vmem:[%s5187_s16 + $0x18] sm:$0xff] %v3874_v55  ;;  %3895 = vpow2.f32 %v3303_v53 }
 0x6d2   : > { %v3878_v26 = vpop.eup %3877  ;;  %2998 = vst [vmem:[%s5187_s16 + $0x8] sm:$0xff] %v3876_v15  ;;  %3897 = vpow2.f32 %v3306_v51 }
 0x6d3   : > { %v3880_v5 = vpop.eup %3879  ;;  %v2911_v42 = vadd.f32 1.0, %v3878_v26  ;;  %3899 = vpow2.f32 %v3304_v1 }
 0x6d4   : > { %v3882_v40 = vpop.eup %3881  ;;  %v2909_v23 = vadd.f32 1.0, %v3880_v5 }
 0x6d5   : > { %v3884_v58 = vpop.eup %3883  ;;  %3901 = vrcp.f32 %v2911_v42  ;;  %v2912_v61 = vadd.f32 1.0, %v3882_v40 }
 0x6d6   : > { %v3886_v54 = vpop.eup %3885  ;;  %3903 = vrcp.f32 %v2909_v23  ;;  %v2910_v60 = vadd.f32 1.0, %v3884_v58 }
 0x6d7   : > { %v3888_v39 = vpop.eup %3887  ;;  %3003 = vst [vmem:[%s5187_s16 + $0x30] sm:$0xff] %v3886_v54  ;;  %3905 = vrcp.f32 %v2912_v61 }
 0x6d8   : > { %v3890_v44 = vpop.eup %3889  ;;  %3001 = vst [vmem:[%s5187_s16 + $0x20] sm:$0xff] %v3888_v39  ;;  %3907 = vrcp.f32 %v2910_v60 }
 0x6d9   : > { %v3892_v62 = vpop.eup %3891  ;;  %3004 = vst [vmem:[%s5187_s16 + $0x38] sm:$0xff] %v3890_v44 }
 0x6da   : > { %v3894_v14 = vpop.eup %3893  ;;  %3002 = vst [vmem:[%s5187_s16 + $0x28] sm:$0xff] %v3892_v62 }
 0x6db   : > { %v3896_v11 = vpop.eup %3895  ;;  %v2915_v13 = vadd.f32 1.0, %v3894_v14 }
 0x6dc   : > { %v3898_v7 = vpop.eup %3897  ;;  %v2913_v43 = vadd.f32 1.0, %v3896_v11 }
 0x6dd   : > { %v3900_v33 = vpop.eup %3899  ;;  %3909 = vrcp.f32 %v2915_v13  ;;  %v2916_v25 = vadd.f32 1.0, %v3898_v7 }
 0x6de   : > { %3911 = vrcp.f32 %v2913_v43  ;;  %v2914_v27 = vadd.f32 1.0, %v3900_v33 }
 0x6df   : > { %v3902_v22 = vpop.eup %3901  ;;  %3913 = vrcp.f32 %v2916_v25  ;;  %v3690_v0 = vpop.f32.mrb[80].mxu0 }
 0x6e0   : > { %v3904_v48 = vpop.eup %3903  ;;  %3007 = vst [vmem:[%s5187_s16 + $0x50] sm:$0xff] %v3902_v22  ;;  %3915 = vrcp.f32 %v2914_v27  ;;  %v2751_v63 = vadd.f32 %v3690_v0, %v5166_v30  ;;  %v2742_v21 = vpop.f32.mrb[81].mxu0 }
 0x6e1   : > { %v3906_v34 = vpop.eup %3905  ;;  %3005 = vst [vmem:[%s5187_s16 + $0x40] sm:$0xff] %v3904_v48  ;;  %v2743_v57 = vadd.f32 %v5166_v30, %v2742_v21  ;;  %v3691_v17 = vpop.f32.mrb[82].mxu0 }
 0x6e2   : > { %v3908_v12 = vpop.eup %3907  ;;  %3008 = vst [vmem:[%s5187_s16 + $0x58] sm:$0xff] %v3906_v34  ;;  %v3309_v32 = vmul.f32 -1.442695, %v2751_v63  ;;  %v2754_v29 = vadd.f32 %v3691_v17, %v5166_v30  ;;  %v2745_v59 = vpop.f32.mrb[83].mxu0 }
 0x6e3   : > { %3006 = vst [vmem:[%s5187_s16 + $0x48] sm:$0xff] %v3908_v12  ;;  %v3307_v46 = vmul.f32 -1.442695, %v2743_v57  ;;  %v2746_v36 = vadd.f32 %v5166_v30, %v2745_v59 }
 0x6e4   : > { %3917 = vpow2.f32 %v3309_v32  ;;  %v3310_v41 = vmul.f32 -1.442695, %v2754_v29 }
 0x6e5   : > { %3919 = vpow2.f32 %v3307_v46  ;;  %v3308_v8 = vmul.f32 -1.442695, %v2746_v36 }
 0x6e6   : > { %3921 = vpow2.f32 %v3310_v41 }
 0x6e7   : > { %v3910_v38 = vpop.eup %3909  ;;  %3923 = vpow2.f32 %v3308_v8 }
 0x6e8   : > { %v3912_v19 = vpop.eup %3911  ;;  %3011 = vst [vmem:[%s5187_s16 + $0x70] sm:$0xff] %v3910_v38 }
 0x6e9   : > { %v3914_v4 = vpop.eup %3913  ;;  %3009 = vst [vmem:[%s5187_s16 + $0x60] sm:$0xff] %v3912_v19 }
 0x6ea   : > { %v3916_v47 = vpop.eup %3915  ;;  %3012 = vst [vmem:[%s5187_s16 + $0x78] sm:$0xff] %v3914_v4 }
 0x6eb   : > { %3010 = vst [vmem:[%s5187_s16 + $0x68] sm:$0xff] %v3916_v47 }
 0x6ee   : > { %v3918_v24 = vpop.eup %3917 }
 0x6ef   : > { %v3920_v50 = vpop.eup %3919  ;;  %v2919_v52 = vadd.f32 1.0, %v3918_v24 }
 0x6f0   : > { %v3922_v6 = vpop.eup %3921  ;;  %v2917_v10 = vadd.f32 1.0, %v3920_v50 }
 0x6f1   : > { %v3924_v2 = vpop.eup %3923  ;;  %3925 = vrcp.f32 %v2919_v52  ;;  %v2920_v20 = vadd.f32 1.0, %v3922_v6 }
 0x6f2   : > { %3927 = vrcp.f32 %v2917_v10  ;;  %v2918_v9 = vadd.f32 1.0, %v3924_v2 }
 0x6f3   : > { %3929 = vrcp.f32 %v2920_v20 }
 0x6f4   : > { %3931 = vrcp.f32 %v2918_v9 }
 0x6f7   : > { %v3694_v56 = vpop.f32.mrb[84].mxu0 }
 0x6f8   : > { %v2767_v35 = vadd.f32 %v3694_v56, %v5166_v30  ;;  %v2758_v37 = vpop.f32.mrb[85].mxu0 }
 0x6f9   : > { %v2759_v3 = vadd.f32 %v5166_v30, %v2758_v37  ;;  %v3695_v16 = vpop.f32.mrb[86].mxu0 }
 0x6fa   : > { %v3313_v28 = vmul.f32 -1.442695, %v2767_v35  ;;  %v2770_v49 = vadd.f32 %v3695_v16, %v5166_v30  ;;  %v2761_v45 = vpop.f32.mrb[87].mxu0 }
 0x6fb   : > { %v3926_v53 = vpop.eup %3925  ;;  %v3311_v18 = vmul.f32 -1.442695, %v2759_v3  ;;  %v2762_v31 = vadd.f32 %v5166_v30, %v2761_v45 }
 0x6fc   : > { %v3928_v51 = vpop.eup %3927  ;;  %3015 = vst [vmem:[%s5187_s16 + $0x90] sm:$0xff] %v3926_v53  ;;  %3933 = vpow2.f32 %v3313_v28  ;;  %v3314_v55 = vmul.f32 -1.442695, %v2770_v49 }
 0x6fd   : > { %v3930_v1 = vpop.eup %3929  ;;  %3013 = vst [vmem:[%s5187_s16 + $0x80] sm:$0xff] %v3928_v51  ;;  %3935 = vpow2.f32 %v3311_v18  ;;  %v3312_v15 = vmul.f32 -1.442695, %v2762_v31 }
 0x6fe   : > { %v3932_v26 = vpop.eup %3931  ;;  %3016 = vst [vmem:[%s5187_s16 + $0x98] sm:$0xff] %v3930_v1  ;;  %3937 = vpow2.f32 %v3314_v55 }
 0x6ff   : > { %3014 = vst [vmem:[%s5187_s16 + $0x88] sm:$0xff] %v3932_v26  ;;  %3939 = vpow2.f32 %v3312_v15 }
 0x706   : > { %v3934_v5 = vpop.eup %3933 }
 0x707   : > { %v3936_v42 = vpop.eup %3935  ;;  %v2923_v40 = vadd.f32 1.0, %v3934_v5 }
 0x708   : > { %v3938_v23 = vpop.eup %3937  ;;  %v2921_v58 = vadd.f32 1.0, %v3936_v42 }
 0x709   : > { %v3940_v61 = vpop.eup %3939  ;;  %3941 = vrcp.f32 %v2923_v40  ;;  %v2924_v54 = vadd.f32 1.0, %v3938_v23 }
 0x70a   : > { %3943 = vrcp.f32 %v2921_v58  ;;  %v2922_v60 = vadd.f32 1.0, %v3940_v61 }
 0x70b   : > { %3945 = vrcp.f32 %v2924_v54 }
 0x70c   : > { %3947 = vrcp.f32 %v2922_v60 }
 0x70f   : > { %v3698_v39 = vpop.f32.mrb[88].mxu0 }
 0x710   : > { %v2783_v44 = vadd.f32 %v3698_v39, %v5166_v30  ;;  %v2774_v62 = vpop.f32.mrb[89].mxu0 }
 0x711   : > { %v2775_v14 = vadd.f32 %v5166_v30, %v2774_v62  ;;  %v3699_v11 = vpop.f32.mrb[90].mxu0 }
 0x712   : > { %v3317_v13 = vmul.f32 -1.442695, %v2783_v44  ;;  %v2786_v7 = vadd.f32 %v3699_v11, %v5166_v30  ;;  %v2777_v43 = vpop.f32.mrb[91].mxu0 }
 0x713   : > { %v3942_v33 = vpop.eup %3941  ;;  %v3315_v25 = vmul.f32 -1.442695, %v2775_v14  ;;  %v2778_v27 = vadd.f32 %v5166_v30, %v2777_v43 }
 0x714   : > { %v3944_v22 = vpop.eup %3943  ;;  %3019 = vst [vmem:[%s5187_s16 + $0xb0] sm:$0xff] %v3942_v33  ;;  %3949 = vpow2.f32 %v3317_v13  ;;  %v3318_v0 = vmul.f32 -1.442695, %v2786_v7 }
 0x715   : > { %v3946_v48 = vpop.eup %3945  ;;  %3017 = vst [vmem:[%s5187_s16 + $0xa0] sm:$0xff] %v3944_v22  ;;  %3951 = vpow2.f32 %v3315_v25  ;;  %v3316_v63 = vmul.f32 -1.442695, %v2778_v27 }
 0x716   : > { %v3948_v21 = vpop.eup %3947  ;;  %3020 = vst [vmem:[%s5187_s16 + $0xb8] sm:$0xff] %v3946_v48  ;;  %3953 = vpow2.f32 %v3318_v0 }
 0x717   : > { %3018 = vst [vmem:[%s5187_s16 + $0xa8] sm:$0xff] %v3948_v21  ;;  %3955 = vpow2.f32 %v3316_v63 }
 0x71e   : > { %v3950_v34 = vpop.eup %3949  ;;  %v3702_v57 = vpop.f32.mrb[92].mxu0 }
 0x71f   : > { %v3952_v17 = vpop.eup %3951  ;;  %v2927_v12 = vadd.f32 1.0, %v3950_v34  ;;  %v2799_v32 = vadd.f32 %v3702_v57, %v5166_v30  ;;  %v2790_v29 = vpop.f32.mrb[93].mxu0 }
 0x720   : > { %v3954_v59 = vpop.eup %3953  ;;  %v2925_v46 = vadd.f32 1.0, %v3952_v17  ;;  %v2791_v36 = vadd.f32 %v5166_v30, %v2790_v29  ;;  %v3703_v41 = vpop.f32.mrb[94].mxu0 }
 0x721   : > { %v3956_v8 = vpop.eup %3955  ;;  %3957 = vrcp.f32 %v2927_v12  ;;  %v2928_v38 = vadd.f32 1.0, %v3954_v59  ;;  %v3321_v19 = vmul.f32 -1.442695, %v2799_v32  ;;  %v2802_v4 = vadd.f32 %v3703_v41, %v5166_v30  ;;  %v2793_v47 = vpop.f32.mrb[95].mxu0 }
 0x722   : > { %3959 = vrcp.f32 %v2925_v46  ;;  %v2926_v24 = vadd.f32 1.0, %v3956_v8  ;;  %v3319_v50 = vmul.f32 -1.442695, %v2791_v36  ;;  %v2794_v52 = vadd.f32 %v5166_v30, %v2793_v47 }
 0x723   : > { %3961 = vrcp.f32 %v2928_v38  ;;  %v3322_v6 = vmul.f32 -1.442695, %v2802_v4 }
 0x724   : > { %3963 = vrcp.f32 %v2926_v24  ;;  %v3320_v10 = vmul.f32 -1.442695, %v2794_v52 }
 0x725   : > { %3965 = vpow2.f32 %v3321_v19 }
 0x726   : > { %3967 = vpow2.f32 %v3319_v50 }
 0x727   : > { %3969 = vpow2.f32 %v3322_v6 }
 0x728   : > { %3971 = vpow2.f32 %v3320_v10 }
 0x72b   : > { %v3958_v2 = vpop.eup %3957 }
 0x72c   : > { %v3960_v20 = vpop.eup %3959  ;;  %3023 = vst [vmem:[%s5187_s16 + $0xd0] sm:$0xff] %v3958_v2 }
 0x72d   : > { %v3962_v9 = vpop.eup %3961  ;;  %3021 = vst [vmem:[%s5187_s16 + $0xc0] sm:$0xff] %v3960_v20 }
 0x72e   : > { %v3964_v56 = vpop.eup %3963  ;;  %3024 = vst [vmem:[%s5187_s16 + $0xd8] sm:$0xff] %v3962_v9 }
 0x72f   : > { %v3966_v35 = vpop.eup %3965  ;;  %3022 = vst [vmem:[%s5187_s16 + $0xc8] sm:$0xff] %v3964_v56 }
 0x730   : > { %v3968_v30 = vpop.eup %3967  ;;  %v2931_v37 = vadd.f32 1.0, %v3966_v35 }
 0x731   : > { %v3970_v3 = vpop.eup %3969  ;;  %v2929_v16 = vadd.f32 1.0, %v3968_v30 }
 0x732   : > { %v3972_v28 = vpop.eup %3971  ;;  %3973 = vrcp.f32 %v2931_v37  ;;  %v2932_v49 = vadd.f32 1.0, %v3970_v3 }
 0x733   : > { %3975 = vrcp.f32 %v2929_v16  ;;  %v2930_v45 = vadd.f32 1.0, %v3972_v28 }
 0x734   : > { %3977 = vrcp.f32 %v2932_v49 }
 0x735   : > { %3979 = vrcp.f32 %v2930_v45 }
 0x73c   : > { %v3974_v53 = vpop.eup %3973 }
 0x73d   : > { %v3976_v18 = vpop.eup %3975  ;;  %3027 = vst [vmem:[%s5187_s16 + $0xf0] sm:$0xff] %v3974_v53 }
 0x73e   : > { %v3978_v31 = vpop.eup %3977  ;;  %3025 = vst [vmem:[%s5187_s16 + $0xe0] sm:$0xff] %v3976_v18 }
 0x73f   : > { %v3980_v51 = vpop.eup %3979  ;;  %3028 = vst [vmem:[%s5187_s16 + $0xf8] sm:$0xff] %v3978_v31 }
 0x740   : > { %3026 = vst [vmem:[%s5187_s16 + $0xe8] sm:$0xff] %v3980_v51 }
 0x741   : > { %4022 = shalt.err (!%p4019_p7)
}
 0x742   : > { %s4023_s10 = scalar_lea.hbm %s5239_s6, 4096  ;;  %s4027_s13 = scalar_lea.hbm %s5293_s4, 8192 }
 0x743   : > { %p4024_p8 = scmp.ne.s32.totalorder %s5239_s6, %s4023_s10  ;;  %p4028_p1 = scmp.lt.u32.totalorder %s5239_s6, %s5293_s4 }
 0x744   : > { %p4029_p0 = scmp.lt.u32.totalorder %s4027_s13, %s4023_s10  ;;  %p4031_p6 = scmp.lt.u32.totalorder %s4023_s10, %s5239_s6 }
 0x745   : > { %p4025_p11 = pnand %p4024_p8, %p5381_p9 }
 0x746   : > { %p4030_p5 = por %p4029_p0, %p4028_p1 }
 0x747   : > { %p4026_p13 = pneg %p4025_p11 }
 0x748   : > { %p4032_p10 = por %p4031_p6, %p4030_p5 }
 0x74a   : > { %p4033_p12 = pnand %p4032_p10, %p4026_p13 }
 0x74c   : > { %4036 = shalt.err (!%p4033_p12)
}
 0x74d   : > { %s4083_s16 = smov 128   ;;  %s4084_s17 = smov 8  }
 0x74e   : > { %3708 = dma.vmem_to_hbm [thread:$0]  (%p5381_p9), %s5241_s23, 4096, %s5239_s6, %s5248_s22, %s4083_s16, %s4083_s16, %s4084_s17  }
 0x74f PF: > { %p3720_p2 = scmp.ge.s32.totalorder %s4075_s21, 2  ;;  %s3067_s25 = sand.u32 1, %s4063_s18  }
 0x750   : > { %p5382_p3 = scmp.ne.s32.totalorder %s5313_s29, 0  ;;  %s3068_s26 = scalar_lea.sflag [#allocation4], %s3067_s25 }
 0x752   : > { %p3715_p4 = pnand %p3720_p2, %p5382_p3 }
 0x754   : > { %4058 = dma.done.wait (!%p3715_p4), %s3068_s26, 4096  }
 0x755   : > { %4060 = vsyncadd (!%p3715_p4), %s3068_s26, 4294963200  ;;  %p17_p7 = scmp.ge.s32.totalorder %s4140_s24, 4   ;;  %s5383_s18 = smov %s4067_s19 }
 0x756   : > { %s5384_s19 = smov %s4071_s20  ;;  %s5385_s20 = smov %s4151_s27 }
 0x757   : > { %s5386_s21 = smov %s4140_s24  ;;  %19 = sbr.rel (!%p17_p7) target bundleno = 4 (0x4), region = 91 }
 0x75e   :  { %3081 = vsyncpa [#allocation3], 1 }
 0x75f   :  { %3083 = vsyncpa [#allocation3 + $0x1], 1 }
 0x760   :  { %3084 = vsyncpa [#allocation4], 1 }
 0x761   :  { %3086 = vsyncpa [#allocation4 + $0x1], 1 }

</bundles_post_ra>
